<compile_context>
chip_gen: v7x
topology: tpu7x:2x2x1
jax: 0.10.0
libtpu: 0.0.40
codegen_flags: <defaults>
</compile_context>

<pallas_src>
import jax
import jax.numpy as jnp
from jax.experimental import pallas as pl
from jax.experimental.pallas import tpu as pltpu

BN_EPS = 1e-5
PADL = 128          # halo columns each side of the extended scratch (needs >= Wp+1)


def _round_up(x, m):
    return (x + m - 1) // m * m


def _make_kernel(B, H, W, c_in_pad, c_out):
    HP, WP = H + 2, W + 2
    S = _round_up(HP * WP, 128)            # per-image column block (lane aligned)
    N = B * S                              # total flattened padded-grid columns
    KR = 9 * c_in_pad + 1                  # im2col rows: 9 taps * C channels + ones row (bias)
    inv_cnt = 1.0 / (B * H * W)
    inv_hw = 1.0 / (H * W)
    inv_hw1 = 1.0 / (H * W - 1)            # torch.std default: unbiased (ddof=1)

    def kernel(shared_ref, guide_ref, masks_ref,
               wa_ref, ws_ref, wn_ref, wgb_ref,
               out_ref, e0, p0, e1, p1):
        # One-time init: zero only the halos of the extended buffers and write
        # the constant ones row (bias column) of the im2col buffers.  The
        # interiors are fully overwritten before every use.
        for e in (e0, e1):
            e[:, :PADL] = jnp.zeros((c_in_pad, PADL), jnp.float32)
            e[:, PADL + N:] = jnp.zeros((c_in_pad, PADL), jnp.float32)
        for p in (p0, p1):
            p[KR - 1:KR, :] = jnp.ones((1, N), jnp.float32)

        def conv3x3(x, w_ref, e_ref, p_ref):
            # x: (c_in_pad, N) activation with zero halo columns; w_ref: (cout, KR).
            # Returns (cout, N) conv output on the same padded grid (halo columns
            # are garbage and must be masked by the caller if reduced / chained).
            e_ref[:, PADL:PADL + N] = x
            for t in range(9):
                dy, dx = t // 3, t % 3
                off = PADL + (dy - 1) * WP + (dx - 1)
                p_ref[t * c_in_pad:(t + 1) * c_in_pad, :] = e_ref[:, off:off + N]
            # single MXU push per conv: (cout, KR) @ (KR, N)
            return jnp.dot(w_ref[...], p_ref[...],
                           preferred_element_type=jnp.float32)

        masks = masks_ref[...]                               # (B, N) per-image interior masks
        m_all = jnp.sum(masks, axis=0, keepdims=True)        # (1, N) full interior mask

        # ---- guide branch: Conv3x3 -> BatchNorm2d(affine=False, batch stats) -> ReLU
        # (own scratch pair so it can overlap the shared-feature MXU chain)
        z = conv3x3(guide_ref[...], wn_ref, e1, p1) * m_all
        mu = jnp.sum(z, axis=1, keepdims=True) * inv_cnt
        dz = (z - mu) * m_all
        var = jnp.sum(dz * dz, axis=1, keepdims=True) * inv_cnt     # biased batch variance
        gn = jnp.maximum((z - mu) * jax.lax.rsqrt(var + BN_EPS), 0.0)

        # ---- shared chain: align -> conv_shared -> fused (gamma | beta) conv
        aligned = conv3x3(shared_ref[...], wa_ref, e0, p0) * m_all
        feat = conv3x3(aligned, ws_ref, e0, p0) * m_all
        gb = conv3x3(feat, wgb_ref, e0, p0)                  # (2*c_out, N)
        gamma = gb[:c_out, :]
        beta = gb[c_out:, :]

        # per-image mean / unbiased std of `aligned` over the spatial dims,
        # broadcast back onto the flattened padded grid via the per-image masks.
        mean_full = jnp.zeros((c_out, N), jnp.float32)
        std_full = jnp.zeros((c_out, N), jnp.float32)
        for b in range(B):
            mb = masks[b:b + 1, :]
            mu_b = jnp.sum(aligned * mb, axis=1, keepdims=True) * inv_hw
            dev = (aligned - mu_b) * mb
            std_b = jnp.sqrt(jnp.sum(dev * dev, axis=1, keepdims=True) * inv_hw1)
            mean_full = mean_full + mu_b * mb
            std_full = std_full + std_b * mb

        # lane-dense full-width store
        out_ref[...] = gn * (gamma + std_full) + (beta + mean_full)

    return kernel, S, N, KR


def feature_linear_enhancement(shared_nchw, guide_nchw, params):
    """NCHW in / NCHW out, parameters in PyTorch OIHW layout."""
    B, c_in, H, W = shared_nchw.shape
    c_guide = guide_nchw.shape[1]
    c_out = params["align_w"].shape[0]
    c_in_pad = max(c_in, c_guide, c_out)   # every conv input padded to this many channels
    HP, WP = H + 2, W + 2

    kernel, S, N, KR = _make_kernel(B, H, W, c_in_pad, c_out)

    def prep_act(x_nchw):
        # NCHW -> channels-first flattened padded grid (c_in_pad, N), zero halo.
        _, C, _, _ = x_nchw.shape
        x = jnp.transpose(x_nchw, (1, 0, 2, 3)).astype(jnp.float32)    # (C, B, H, W)
        x = jnp.pad(x, ((0, c_in_pad - C), (0, 0), (1, 1), (1, 1)))    # channel + spatial zero pad
        x = x.reshape(c_in_pad, B, HP * WP)
        x = jnp.pad(x, ((0, 0), (0, 0), (0, S - HP * WP)))
        return x.reshape(c_in_pad, N)

    def prep_w(w_oihw, b_vec):
        # OIHW -> (O, 9*c_in_pad + 1): tap-major / channel-minor, bias as last column.
        O, I = w_oihw.shape[0], w_oihw.shape[1]
        w = jnp.pad(w_oihw.astype(jnp.float32),
                    ((0, 0), (0, c_in_pad - I), (0, 0), (0, 0)))
        w = jnp.transpose(w, (0, 2, 3, 1)).reshape(O, 9 * c_in_pad)
        return jnp.concatenate([w, b_vec.astype(jnp.float32).reshape(O, 1)], axis=1)

    # per-image interior masks over the flattened padded grid
    m2d = jnp.zeros((HP, WP), jnp.float32).at[1:H + 1, 1:W + 1].set(1.0)
    m_img = jnp.pad(m2d.reshape(-1), (0, S - HP * WP))
    masks = (jnp.eye(B, dtype=jnp.float32)[:, :, None] * m_img[None, None, :]).reshape(B, N)

    args = (
        prep_act(shared_nchw),
        prep_act(guide_nchw),
        masks,
        prep_w(params["align_w"], params["align_b"]),
        prep_w(params["shared_w"], params["shared_b"]),
        prep_w(params["norm_w"], params["norm_b"]),
        # gamma and beta convs fused into one conv with 2*c_out outputs
        prep_w(jnp.concatenate([params["gamma_w"], params["beta_w"]], axis=0),
               jnp.concatenate([params["gamma_b"], params["beta_b"]], axis=0)),
    )

    vmem = pl.BlockSpec(memory_space=pltpu.MemorySpace.VMEM)
    out_flat = pl.pallas_call(
        kernel,
        out_shape=jax.ShapeDtypeStruct((c_out, N), jnp.float32),
        in_specs=[vmem] * len(args),
        out_specs=vmem,
        scratch_shapes=[
            pltpu.VMEM((c_in_pad, N + 2 * PADL), jnp.float32),   # E0: main-chain extended buffer
            pltpu.VMEM((KR, N), jnp.float32),                    # P0: main-chain im2col matrix
            pltpu.VMEM((c_in_pad, N + 2 * PADL), jnp.float32),   # E1: guide-branch extended buffer
            pltpu.VMEM((KR, N), jnp.float32),                    # P1: guide-branch im2col matrix
        ],
    )(*args)

    # extract interior of the padded grid and return NCHW
    out = out_flat.reshape(c_out, B, S)[:, :, :HP * WP].reshape(c_out, B, HP, WP)
    out = out[:, :, 1:H + 1, 1:W + 1]
    return jnp.transpose(out, (1, 0, 2, 3))


feature_linear_enhancement_jit = jax.jit(feature_linear_enhancement)


# ---------------- plain-JAX reference (NCHW, mirrors the torch module) ----------------
def _conv_ref(x, w, b):
    y = jax.lax.conv_general_dilated(x, w, (1, 1), ((1, 1), (1, 1)),
                                     dimension_numbers=("NCHW", "OIHW", "NCHW"))
    return y + b[None, :, None, None]


def reference_forward(shared, guide, p):
    aligned = _conv_ref(shared, p["align_w"], p["align_b"])
    feat = _conv_ref(aligned, p["shared_w"], p["shared_b"])
    z = _conv_ref(guide, p["norm_w"], p["norm_b"])
    mu = jnp.mean(z, axis=(0, 2, 3), keepdims=True)
    var = jnp.mean((z - mu) ** 2, axis=(0, 2, 3), keepdims=True)
    gn = jnp.maximum((z - mu) / jnp.sqrt(var + BN_EPS), 0.0)
    gamma = _conv_ref(feat, p["gamma_w"], p["gamma_b"])
    beta = _conv_ref(feat, p["beta_w"], p["beta_b"])
    smean = jnp.mean(aligned, axis=(2, 3), keepdims=True)
    sstd = jnp.std(aligned, axis=(2, 3), keepdims=True, ddof=1)
    return gn * (gamma + sstd) + (beta + smean)


if __name__ == "__main__":
    in_channel, out_channel = 8, 8
    guide_channel = in_channel // 4 * 3          # = 6
    B, H, W = 2, 16, 16

    key = jax.random.PRNGKey(0)
    ks = jax.random.split(key, 10)
    params = {
        "align_w": 0.05 * jax.random.normal(ks[0], (out_channel, in_channel, 3, 3), jnp.float32),
        "align_b": 0.05 * jax.random.normal(ks[1], (out_channel,), jnp.float32),
        "shared_w": 0.05 * jax.random.normal(ks[2], (out_channel, out_channel, 3, 3), jnp.float32),
        "shared_b": 0.05 * jax.random.normal(ks[3], (out_channel,), jnp.float32),
        "norm_w": 0.05 * jax.random.normal(ks[4], (out_channel, guide_channel, 3, 3), jnp.float32),
        "norm_b": 0.05 * jax.random.normal(ks[5], (out_channel,), jnp.float32),
        # conv_gamma / conv_beta: weight ~ N(0, 0.01), bias = 0 (matches __init__)
        "gamma_w": 0.01 * jax.random.normal(ks[6], (out_channel, out_channel, 3, 3), jnp.float32),
        "gamma_b": jnp.zeros((out_channel,), jnp.float32),
        "beta_w": 0.01 * jax.random.normal(ks[7], (out_channel, out_channel, 3, 3), jnp.float32),
        "beta_b": jnp.zeros((out_channel,), jnp.float32),
    }

    shared_feature = jax.random.normal(ks[8], (B, in_channel, H, W), jnp.float32)
    guide_feature = jax.random.normal(ks[9], (B, guide_channel, H, W), jnp.float32)

    out = feature_linear_enhancement_jit(shared_feature, guide_feature, params)
    out = jax.block_until_ready(out)

    ref = reference_forward(shared_feature, guide_feature, params)
    assert out.shape == (B, out_channel, H, W)
    assert bool(jnp.allclose(out, ref, rtol=1e-3, atol=1e-3)), \
        float(jnp.max(jnp.abs(out - ref)))
    print("KERNEL_OK")
</pallas_src>

<mosaic_0001>
module attributes {stable_mosaic.version = 11 : i64} {
  func.func @kernel(%arg0: memref<8x768xf32, #tpu.memory_space<vmem>>, %arg1: memref<8x768xf32, #tpu.memory_space<vmem>>, %arg2: memref<2x768xf32, #tpu.memory_space<vmem>>, %arg3: memref<8x73xf32, #tpu.memory_space<vmem>>, %arg4: memref<8x73xf32, #tpu.memory_space<vmem>>, %arg5: memref<8x73xf32, #tpu.memory_space<vmem>>, %arg6: memref<16x73xf32, #tpu.memory_space<vmem>>, %arg7: memref<8x768xf32, #tpu.memory_space<vmem>>, %arg8: memref<8x1024xf32, #tpu.memory_space<vmem>>, %arg9: memref<73x768xf32, #tpu.memory_space<vmem>>, %arg10: memref<8x1024xf32, #tpu.memory_space<vmem>>, %arg11: memref<73x768xf32, #tpu.memory_space<vmem>>) attributes {dimension_semantics = [], scalar_prefetch = 0 : i64, scratch_operands = 4 : i64, tpu.core_type = #tpu.core_type<tc>} {
    %cst = arith.constant 0.000000e+00 : f32
    %0 = vector.broadcast %cst : f32 to vector<8x128xf32>
    %c0 = arith.constant 0 : index
    %c0_0 = arith.constant 0 : index
    %1 = vector.load %arg8[%c0, %c0_0] : memref<8x1024xf32, #tpu.memory_space<vmem>>, vector<8x128xf32>
    tpu.vector_store %arg8[%c0, %c0_0], %0 {strides = array<i32>} : memref<8x1024xf32, #tpu.memory_space<vmem>>, vector<8x128xf32>,
    %cst_1 = arith.constant 0.000000e+00 : f32
    %2 = vector.broadcast %cst_1 : f32 to vector<8x128xf32>
    %c0_2 = arith.constant 0 : index
    %c896 = arith.constant 896 : index
    %3 = vector.load %arg8[%c0_2, %c896] : memref<8x1024xf32, #tpu.memory_space<vmem>>, vector<8x128xf32>
    tpu.vector_store %arg8[%c0_2, %c896], %2 {strides = array<i32>} : memref<8x1024xf32, #tpu.memory_space<vmem>>, vector<8x128xf32>,
    %cst_3 = arith.constant 0.000000e+00 : f32
    %4 = vector.broadcast %cst_3 : f32 to vector<8x128xf32>
    %c0_4 = arith.constant 0 : index
    %c0_5 = arith.constant 0 : index
    %5 = vector.load %arg10[%c0_4, %c0_5] : memref<8x1024xf32, #tpu.memory_space<vmem>>, vector<8x128xf32>
    tpu.vector_store %arg10[%c0_4, %c0_5], %4 {strides = array<i32>} : memref<8x1024xf32, #tpu.memory_space<vmem>>, vector<8x128xf32>,
    %cst_6 = arith.constant 0.000000e+00 : f32
    %6 = vector.broadcast %cst_6 : f32 to vector<8x128xf32>
    %c0_7 = arith.constant 0 : index
    %c896_8 = arith.constant 896 : index
    %7 = vector.load %arg10[%c0_7, %c896_8] : memref<8x1024xf32, #tpu.memory_space<vmem>>, vector<8x128xf32>
    tpu.vector_store %arg10[%c0_7, %c896_8], %6 {strides = array<i32>} : memref<8x1024xf32, #tpu.memory_space<vmem>>, vector<8x128xf32>,
    %cst_9 = arith.constant 1.000000e+00 : f32
    %8 = vector.broadcast %cst_9 : f32 to vector<1x768xf32>
    %c72 = arith.constant 72 : index
    %c0_10 = arith.constant 0 : index
    %9 = vector.load %arg9[%c72, %c0_10] : memref<73x768xf32, #tpu.memory_space<vmem>>, vector<1x768xf32>
    tpu.vector_store %arg9[%c72, %c0_10], %8 {strides = array<i32>} : memref<73x768xf32, #tpu.memory_space<vmem>>, vector<1x768xf32>,
    %cst_11 = arith.constant 1.000000e+00 : f32
    %10 = vector.broadcast %cst_11 : f32 to vector<1x768xf32>
    %c72_12 = arith.constant 72 : index
    %c0_13 = arith.constant 0 : index
    %11 = vector.load %arg11[%c72_12, %c0_13] : memref<73x768xf32, #tpu.memory_space<vmem>>, vector<1x768xf32>
    tpu.vector_store %arg11[%c72_12, %c0_13], %10 {strides = array<i32>} : memref<73x768xf32, #tpu.memory_space<vmem>>, vector<1x768xf32>,
    %c0_14 = arith.constant 0 : index
    %c0_15 = arith.constant 0 : index
    %12 = vector.load %arg2[%c0_14, %c0_15] : memref<2x768xf32, #tpu.memory_space<vmem>>, vector<2x768xf32>
    %cst_16 = arith.constant dense<0.000000e+00> : vector<768xf32>
    %13 = vector.multi_reduction <add>, %12, %cst_16 [0] : vector<2x768xf32> to vector<768xf32>
    %14 = vector.shape_cast %13 : vector<768xf32> to vector<1x768xf32>
    %c0_17 = arith.constant 0 : index
    %c0_18 = arith.constant 0 : index
    %15 = vector.load %arg1[%c0_17, %c0_18] : memref<8x768xf32, #tpu.memory_space<vmem>>, vector<8x768xf32>
    %c0_19 = arith.constant 0 : index
    %c128 = arith.constant 128 : index
    %16 = vector.load %arg10[%c0_19, %c128] : memref<8x1024xf32, #tpu.memory_space<vmem>>, vector<8x768xf32>
    tpu.vector_store %arg10[%c0_19, %c128], %15 {strides = array<i32>} : memref<8x1024xf32, #tpu.memory_space<vmem>>, vector<8x768xf32>,
    %c0_20 = arith.constant 0 : index
    %c109 = arith.constant 109 : index
    %17 = vector.load %arg10[%c0_20, %c109] : memref<8x1024xf32, #tpu.memory_space<vmem>>, vector<8x768xf32>
    %c0_21 = arith.constant 0 : index
    %c0_22 = arith.constant 0 : index
    %18 = vector.load %arg11[%c0_21, %c0_22] : memref<73x768xf32, #tpu.memory_space<vmem>>, vector<8x768xf32>
    tpu.vector_store %arg11[%c0_21, %c0_22], %17 {strides = array<i32>} : memref<73x768xf32, #tpu.memory_space<vmem>>, vector<8x768xf32>,
    %c0_23 = arith.constant 0 : index
    %c110 = arith.constant 110 : index
    %19 = vector.load %arg10[%c0_23, %c110] : memref<8x1024xf32, #tpu.memory_space<vmem>>, vector<8x768xf32>
    %c8 = arith.constant 8 : index
    %c0_24 = arith.constant 0 : index
    %20 = vector.load %arg11[%c8, %c0_24] : memref<73x768xf32, #tpu.memory_space<vmem>>, vector<8x768xf32>
    tpu.vector_store %arg11[%c8, %c0_24], %19 {strides = array<i32>} : memref<73x768xf32, #tpu.memory_space<vmem>>, vector<8x768xf32>,
    %c0_25 = arith.constant 0 : index
    %c111 = arith.constant 111 : index
    %21 = vector.load %arg10[%c0_25, %c111] : memref<8x1024xf32, #tpu.memory_space<vmem>>, vector<8x768xf32>
    %c16 = arith.constant 16 : index
    %c0_26 = arith.constant 0 : index
    %22 = vector.load %arg11[%c16, %c0_26] : memref<73x768xf32, #tpu.memory_space<vmem>>, vector<8x768xf32>
    tpu.vector_store %arg11[%c16, %c0_26], %21 {strides = array<i32>} : memref<73x768xf32, #tpu.memory_space<vmem>>, vector<8x768xf32>,
    %c0_27 = arith.constant 0 : index
    %c127 = arith.constant 127 : index
    %23 = vector.load %arg10[%c0_27, %c127] : memref<8x1024xf32, #tpu.memory_space<vmem>>, vector<8x768xf32>
    %c24 = arith.constant 24 : index
    %c0_28 = arith.constant 0 : index
    %24 = vector.load %arg11[%c24, %c0_28] : memref<73x768xf32, #tpu.memory_space<vmem>>, vector<8x768xf32>
    tpu.vector_store %arg11[%c24, %c0_28], %23 {strides = array<i32>} : memref<73x768xf32, #tpu.memory_space<vmem>>, vector<8x768xf32>,
    %c0_29 = arith.constant 0 : index
    %c128_30 = arith.constant 128 : index
    %25 = vector.load %arg10[%c0_29, %c128_30] : memref<8x1024xf32, #tpu.memory_space<vmem>>, vector<8x768xf32>
    %c32 = arith.constant 32 : index
    %c0_31 = arith.constant 0 : index
    %26 = vector.load %arg11[%c32, %c0_31] : memref<73x768xf32, #tpu.memory_space<vmem>>, vector<8x768xf32>
    tpu.vector_store %arg11[%c32, %c0_31], %25 {strides = array<i32>} : memref<73x768xf32, #tpu.memory_space<vmem>>, vector<8x768xf32>,
    %c0_32 = arith.constant 0 : index
    %c129 = arith.constant 129 : index
    %27 = vector.load %arg10[%c0_32, %c129] : memref<8x1024xf32, #tpu.memory_space<vmem>>, vector<8x768xf32>
    %c40 = arith.constant 40 : index
    %c0_33 = arith.constant 0 : index
    %28 = vector.load %arg11[%c40, %c0_33] : memref<73x768xf32, #tpu.memory_space<vmem>>, vector<8x768xf32>
    tpu.vector_store %arg11[%c40, %c0_33], %27 {strides = array<i32>} : memref<73x768xf32, #tpu.memory_space<vmem>>, vector<8x768xf32>,
    %c0_34 = arith.constant 0 : index
    %c145 = arith.constant 145 : index
    %29 = vector.load %arg10[%c0_34, %c145] : memref<8x1024xf32, #tpu.memory_space<vmem>>, vector<8x768xf32>
    %c48 = arith.constant 48 : index
    %c0_35 = arith.constant 0 : index
    %30 = vector.load %arg11[%c48, %c0_35] : memref<73x768xf32, #tpu.memory_space<vmem>>, vector<8x768xf32>
    tpu.vector_store %arg11[%c48, %c0_35], %29 {strides = array<i32>} : memref<73x768xf32, #tpu.memory_space<vmem>>, vector<8x768xf32>,
    %c0_36 = arith.constant 0 : index
    %c146 = arith.constant 146 : index
    %31 = vector.load %arg10[%c0_36, %c146] : memref<8x1024xf32, #tpu.memory_space<vmem>>, vector<8x768xf32>
    %c56 = arith.constant 56 : index
    %c0_37 = arith.constant 0 : index
    %32 = vector.load %arg11[%c56, %c0_37] : memref<73x768xf32, #tpu.memory_space<vmem>>, vector<8x768xf32>
    tpu.vector_store %arg11[%c56, %c0_37], %31 {strides = array<i32>} : memref<73x768xf32, #tpu.memory_space<vmem>>, vector<8x768xf32>,
    %c0_38 = arith.constant 0 : index
    %c147 = arith.constant 147 : index
    %33 = vector.load %arg10[%c0_38, %c147] : memref<8x1024xf32, #tpu.memory_space<vmem>>, vector<8x768xf32>
    %c64 = arith.constant 64 : index
    %c0_39 = arith.constant 0 : index
    %34 = vector.load %arg11[%c64, %c0_39] : memref<73x768xf32, #tpu.memory_space<vmem>>, vector<8x768xf32>
    tpu.vector_store %arg11[%c64, %c0_39], %33 {strides = array<i32>} : memref<73x768xf32, #tpu.memory_space<vmem>>, vector<8x768xf32>,
    %c0_40 = arith.constant 0 : index
    %c0_41 = arith.constant 0 : index
    %35 = vector.load %arg5[%c0_40, %c0_41] : memref<8x73xf32, #tpu.memory_space<vmem>>, vector<8x73xf32>
    %c0_42 = arith.constant 0 : index
    %c0_43 = arith.constant 0 : index
    %36 = vector.load %arg11[%c0_42, %c0_43] : memref<73x768xf32, #tpu.memory_space<vmem>>, vector<73x768xf32>
    %cst_44 = arith.constant dense<0.000000e+00> : vector<8x768xf32>
    %37 = tpu.matmul %35, %36, %cst_44 {dimension_numbers = #tpu.dot_dimension_numbers<[1], [0], [0], [1], [0, 0, 1, 1], [], []>} : vector<8x73xf32>, vector<73x768xf32>, vector<8x768xf32> -> vector<8x768xf32>
    %38 = vector.broadcast %14 : vector<1x768xf32> to vector<8x768xf32>
    %39 = arith.mulf %37, %38 : vector<8x768xf32>
    %cst_45 = arith.constant dense<0.000000e+00> : vector<8xf32>
    %40 = vector.multi_reduction <add>, %39, %cst_45 [1] : vector<8x768xf32> to vector<8xf32>
    %41 = vector.shape_cast %40 : vector<8xf32> to vector<8x1xf32>
    %cst_46 = arith.constant 0.001953125 : f32
    %42 = vector.broadcast %cst_46 : f32 to vector<8x1xf32>
    %43 = arith.mulf %41, %42 : vector<8x1xf32>
    %44 = vector.broadcast %43 : vector<8x1xf32> to vector<8x768xf32>
    %45 = arith.subf %39, %44 : vector<8x768xf32>
    %46 = vector.broadcast %14 : vector<1x768xf32> to vector<8x768xf32>
    %47 = arith.mulf %45, %46 : vector<8x768xf32>
    %48 = arith.mulf %47, %47 : vector<8x768xf32>
    %cst_47 = arith.constant dense<0.000000e+00> : vector<8xf32>
    %49 = vector.multi_reduction <add>, %48, %cst_47 [1] : vector<8x768xf32> to vector<8xf32>
    %50 = vector.shape_cast %49 : vector<8xf32> to vector<8x1xf32>
    %cst_48 = arith.constant 0.001953125 : f32
    %51 = vector.broadcast %cst_48 : f32 to vector<8x1xf32>
    %52 = arith.mulf %50, %51 : vector<8x1xf32>
    %53 = vector.broadcast %43 : vector<8x1xf32> to vector<8x768xf32>
    %54 = arith.subf %39, %53 : vector<8x768xf32>
    %cst_49 = arith.constant 9.99999974E-6 : f32
    %55 = vector.broadcast %cst_49 : f32 to vector<8x1xf32>
    %56 = arith.addf %52, %55 : vector<8x1xf32>
    %57 = math.rsqrt %56 : vector<8x1xf32>
    %58 = vector.broadcast %57 : vector<8x1xf32> to vector<8x768xf32>
    %59 = arith.mulf %54, %58 : vector<8x768xf32>
    %cst_50 = arith.constant 0.000000e+00 : f32
    %60 = vector.broadcast %cst_50 : f32 to vector<8x768xf32>
    %61 = arith.maximumf %59, %60 : vector<8x768xf32>
    %c0_51 = arith.constant 0 : index
    %c0_52 = arith.constant 0 : index
    %62 = vector.load %arg0[%c0_51, %c0_52] : memref<8x768xf32, #tpu.memory_space<vmem>>, vector<8x768xf32>
    %c0_53 = arith.constant 0 : index
    %c128_54 = arith.constant 128 : index
    %63 = vector.load %arg8[%c0_53, %c128_54] : memref<8x1024xf32, #tpu.memory_space<vmem>>, vector<8x768xf32>
    tpu.vector_store %arg8[%c0_53, %c128_54], %62 {strides = array<i32>} : memref<8x1024xf32, #tpu.memory_space<vmem>>, vector<8x768xf32>,
    %c0_55 = arith.constant 0 : index
    %c109_56 = arith.constant 109 : index
    %64 = vector.load %arg8[%c0_55, %c109_56] : memref<8x1024xf32, #tpu.memory_space<vmem>>, vector<8x768xf32>
    %c0_57 = arith.constant 0 : index
    %c0_58 = arith.constant 0 : index
    %65 = vector.load %arg9[%c0_57, %c0_58] : memref<73x768xf32, #tpu.memory_space<vmem>>, vector<8x768xf32>
    tpu.vector_store %arg9[%c0_57, %c0_58], %64 {strides = array<i32>} : memref<73x768xf32, #tpu.memory_space<vmem>>, vector<8x768xf32>,
    %c0_59 = arith.constant 0 : index
    %c110_60 = arith.constant 110 : index
    %66 = vector.load %arg8[%c0_59, %c110_60] : memref<8x1024xf32, #tpu.memory_space<vmem>>, vector<8x768xf32>
    %c8_61 = arith.constant 8 : index
    %c0_62 = arith.constant 0 : index
    %67 = vector.load %arg9[%c8_61, %c0_62] : memref<73x768xf32, #tpu.memory_space<vmem>>, vector<8x768xf32>
    tpu.vector_store %arg9[%c8_61, %c0_62], %66 {strides = array<i32>} : memref<73x768xf32, #tpu.memory_space<vmem>>, vector<8x768xf32>,
    %c0_63 = arith.constant 0 : index
    %c111_64 = arith.constant 111 : index
    %68 = vector.load %arg8[%c0_63, %c111_64] : memref<8x1024xf32, #tpu.memory_space<vmem>>, vector<8x768xf32>
    %c16_65 = arith.constant 16 : index
    %c0_66 = arith.constant 0 : index
    %69 = vector.load %arg9[%c16_65, %c0_66] : memref<73x768xf32, #tpu.memory_space<vmem>>, vector<8x768xf32>
    tpu.vector_store %arg9[%c16_65, %c0_66], %68 {strides = array<i32>} : memref<73x768xf32, #tpu.memory_space<vmem>>, vector<8x768xf32>,
    %c0_67 = arith.constant 0 : index
    %c127_68 = arith.constant 127 : index
    %70 = vector.load %arg8[%c0_67, %c127_68] : memref<8x1024xf32, #tpu.memory_space<vmem>>, vector<8x768xf32>
    %c24_69 = arith.constant 24 : index
    %c0_70 = arith.constant 0 : index
    %71 = vector.load %arg9[%c24_69, %c0_70] : memref<73x768xf32, #tpu.memory_space<vmem>>, vector<8x768xf32>
    tpu.vector_store %arg9[%c24_69, %c0_70], %70 {strides = array<i32>} : memref<73x768xf32, #tpu.memory_space<vmem>>, vector<8x768xf32>,
    %c0_71 = arith.constant 0 : index
    %c128_72 = arith.constant 128 : index
    %72 = vector.load %arg8[%c0_71, %c128_72] : memref<8x1024xf32, #tpu.memory_space<vmem>>, vector<8x768xf32>
    %c32_73 = arith.constant 32 : index
    %c0_74 = arith.constant 0 : index
    %73 = vector.load %arg9[%c32_73, %c0_74] : memref<73x768xf32, #tpu.memory_space<vmem>>, vector<8x768xf32>
    tpu.vector_store %arg9[%c32_73, %c0_74], %72 {strides = array<i32>} : memref<73x768xf32, #tpu.memory_space<vmem>>, vector<8x768xf32>,
    %c0_75 = arith.constant 0 : index
    %c129_76 = arith.constant 129 : index
    %74 = vector.load %arg8[%c0_75, %c129_76] : memref<8x1024xf32, #tpu.memory_space<vmem>>, vector<8x768xf32>
    %c40_77 = arith.constant 40 : index
    %c0_78 = arith.constant 0 : index
    %75 = vector.load %arg9[%c40_77, %c0_78] : memref<73x768xf32, #tpu.memory_space<vmem>>, vector<8x768xf32>
    tpu.vector_store %arg9[%c40_77, %c0_78], %74 {strides = array<i32>} : memref<73x768xf32, #tpu.memory_space<vmem>>, vector<8x768xf32>,
    %c0_79 = arith.constant 0 : index
    %c145_80 = arith.constant 145 : index
    %76 = vector.load %arg8[%c0_79, %c145_80] : memref<8x1024xf32, #tpu.memory_space<vmem>>, vector<8x768xf32>
    %c48_81 = arith.constant 48 : index
    %c0_82 = arith.constant 0 : index
    %77 = vector.load %arg9[%c48_81, %c0_82] : memref<73x768xf32, #tpu.memory_space<vmem>>, vector<8x768xf32>
    tpu.vector_store %arg9[%c48_81, %c0_82], %76 {strides = array<i32>} : memref<73x768xf32, #tpu.memory_space<vmem>>, vector<8x768xf32>,
    %c0_83 = arith.constant 0 : index
    %c146_84 = arith.constant 146 : index
    %78 = vector.load %arg8[%c0_83, %c146_84] : memref<8x1024xf32, #tpu.memory_space<vmem>>, vector<8x768xf32>
    %c56_85 = arith.constant 56 : index
    %c0_86 = arith.constant 0 : index
    %79 = vector.load %arg9[%c56_85, %c0_86] : memref<73x768xf32, #tpu.memory_space<vmem>>, vector<8x768xf32>
    tpu.vector_store %arg9[%c56_85, %c0_86], %78 {strides = array<i32>} : memref<73x768xf32, #tpu.memory_space<vmem>>, vector<8x768xf32>,
    %c0_87 = arith.constant 0 : index
    %c147_88 = arith.constant 147 : index
    %80 = vector.load %arg8[%c0_87, %c147_88] : memref<8x1024xf32, #tpu.memory_space<vmem>>, vector<8x768xf32>
    %c64_89 = arith.constant 64 : index
    %c0_90 = arith.constant 0 : index
    %81 = vector.load %arg9[%c64_89, %c0_90] : memref<73x768xf32, #tpu.memory_space<vmem>>, vector<8x768xf32>
    tpu.vector_store %arg9[%c64_89, %c0_90], %80 {strides = array<i32>} : memref<73x768xf32, #tpu.memory_space<vmem>>, vector<8x768xf32>,
    %c0_91 = arith.constant 0 : index
    %c0_92 = arith.constant 0 : index
    %82 = vector.load %arg3[%c0_91, %c0_92] : memref<8x73xf32, #tpu.memory_space<vmem>>, vector<8x73xf32>
    %c0_93 = arith.constant 0 : index
    %c0_94 = arith.constant 0 : index
    %83 = vector.load %arg9[%c0_93, %c0_94] : memref<73x768xf32, #tpu.memory_space<vmem>>, vector<73x768xf32>
    %cst_95 = arith.constant dense<0.000000e+00> : vector<8x768xf32>
    %84 = tpu.matmul %82, %83, %cst_95 {dimension_numbers = #tpu.dot_dimension_numbers<[1], [0], [0], [1], [0, 0, 1, 1], [], []>} : vector<8x73xf32>, vector<73x768xf32>, vector<8x768xf32> -> vector<8x768xf32>
    %85 = vector.broadcast %14 : vector<1x768xf32> to vector<8x768xf32>
    %86 = arith.mulf %84, %85 : vector<8x768xf32>
    %c0_96 = arith.constant 0 : index
    %c128_97 = arith.constant 128 : index
    %87 = vector.load %arg8[%c0_96, %c128_97] : memref<8x1024xf32, #tpu.memory_space<vmem>>, vector<8x768xf32>
    tpu.vector_store %arg8[%c0_96, %c128_97], %86 {strides = array<i32>} : memref<8x1024xf32, #tpu.memory_space<vmem>>, vector<8x768xf32>,
    %c0_98 = arith.constant 0 : index
    %c109_99 = arith.constant 109 : index
    %88 = vector.load %arg8[%c0_98, %c109_99] : memref<8x1024xf32, #tpu.memory_space<vmem>>, vector<8x768xf32>
    %c0_100 = arith.constant 0 : index
    %c0_101 = arith.constant 0 : index
    %89 = vector.load %arg9[%c0_100, %c0_101] : memref<73x768xf32, #tpu.memory_space<vmem>>, vector<8x768xf32>
    tpu.vector_store %arg9[%c0_100, %c0_101], %88 {strides = array<i32>} : memref<73x768xf32, #tpu.memory_space<vmem>>, vector<8x768xf32>,
    %c0_102 = arith.constant 0 : index
    %c110_103 = arith.constant 110 : index
    %90 = vector.load %arg8[%c0_102, %c110_103] : memref<8x1024xf32, #tpu.memory_space<vmem>>, vector<8x768xf32>
    %c8_104 = arith.constant 8 : index
    %c0_105 = arith.constant 0 : index
    %91 = vector.load %arg9[%c8_104, %c0_105] : memref<73x768xf32, #tpu.memory_space<vmem>>, vector<8x768xf32>
    tpu.vector_store %arg9[%c8_104, %c0_105], %90 {strides = array<i32>} : memref<73x768xf32, #tpu.memory_space<vmem>>, vector<8x768xf32>,
    %c0_106 = arith.constant 0 : index
    %c111_107 = arith.constant 111 : index
    %92 = vector.load %arg8[%c0_106, %c111_107] : memref<8x1024xf32, #tpu.memory_space<vmem>>, vector<8x768xf32>
    %c16_108 = arith.constant 16 : index
    %c0_109 = arith.constant 0 : index
    %93 = vector.load %arg9[%c16_108, %c0_109] : memref<73x768xf32, #tpu.memory_space<vmem>>, vector<8x768xf32>
    tpu.vector_store %arg9[%c16_108, %c0_109], %92 {strides = array<i32>} : memref<73x768xf32, #tpu.memory_space<vmem>>, vector<8x768xf32>,
    %c0_110 = arith.constant 0 : index
    %c127_111 = arith.constant 127 : index
    %94 = vector.load %arg8[%c0_110, %c127_111] : memref<8x1024xf32, #tpu.memory_space<vmem>>, vector<8x768xf32>
    %c24_112 = arith.constant 24 : index
    %c0_113 = arith.constant 0 : index
    %95 = vector.load %arg9[%c24_112, %c0_113] : memref<73x768xf32, #tpu.memory_space<vmem>>, vector<8x768xf32>
    tpu.vector_store %arg9[%c24_112, %c0_113], %94 {strides = array<i32>} : memref<73x768xf32, #tpu.memory_space<vmem>>, vector<8x768xf32>,
    %c0_114 = arith.constant 0 : index
    %c128_115 = arith.constant 128 : index
    %96 = vector.load %arg8[%c0_114, %c128_115] : memref<8x1024xf32, #tpu.memory_space<vmem>>, vector<8x768xf32>
    %c32_116 = arith.constant 32 : index
    %c0_117 = arith.constant 0 : index
    %97 = vector.load %arg9[%c32_116, %c0_117] : memref<73x768xf32, #tpu.memory_space<vmem>>, vector<8x768xf32>
    tpu.vector_store %arg9[%c32_116, %c0_117], %96 {strides = array<i32>} : memref<73x768xf32, #tpu.memory_space<vmem>>, vector<8x768xf32>,
    %c0_118 = arith.constant 0 : index
    %c129_119 = arith.constant 129 : index
    %98 = vector.load %arg8[%c0_118, %c129_119] : memref<8x1024xf32, #tpu.memory_space<vmem>>, vector<8x768xf32>
    %c40_120 = arith.constant 40 : index
    %c0_121 = arith.constant 0 : index
    %99 = vector.load %arg9[%c40_120, %c0_121] : memref<73x768xf32, #tpu.memory_space<vmem>>, vector<8x768xf32>
    tpu.vector_store %arg9[%c40_120, %c0_121], %98 {strides = array<i32>} : memref<73x768xf32, #tpu.memory_space<vmem>>, vector<8x768xf32>,
    %c0_122 = arith.constant 0 : index
    %c145_123 = arith.constant 145 : index
    %100 = vector.load %arg8[%c0_122, %c145_123] : memref<8x1024xf32, #tpu.memory_space<vmem>>, vector<8x768xf32>
    %c48_124 = arith.constant 48 : index
    %c0_125 = arith.constant 0 : index
    %101 = vector.load %arg9[%c48_124, %c0_125] : memref<73x768xf32, #tpu.memory_space<vmem>>, vector<8x768xf32>
    tpu.vector_store %arg9[%c48_124, %c0_125], %100 {strides = array<i32>} : memref<73x768xf32, #tpu.memory_space<vmem>>, vector<8x768xf32>,
    %c0_126 = arith.constant 0 : index
    %c146_127 = arith.constant 146 : index
    %102 = vector.load %arg8[%c0_126, %c146_127] : memref<8x1024xf32, #tpu.memory_space<vmem>>, vector<8x768xf32>
    %c56_128 = arith.constant 56 : index
    %c0_129 = arith.constant 0 : index
    %103 = vector.load %arg9[%c56_128, %c0_129] : memref<73x768xf32, #tpu.memory_space<vmem>>, vector<8x768xf32>
    tpu.vector_store %arg9[%c56_128, %c0_129], %102 {strides = array<i32>} : memref<73x768xf32, #tpu.memory_space<vmem>>, vector<8x768xf32>,
    %c0_130 = arith.constant 0 : index
    %c147_131 = arith.constant 147 : index
    %104 = vector.load %arg8[%c0_130, %c147_131] : memref<8x1024xf32, #tpu.memory_space<vmem>>, vector<8x768xf32>
    %c64_132 = arith.constant 64 : index
    %c0_133 = arith.constant 0 : index
    %105 = vector.load %arg9[%c64_132, %c0_133] : memref<73x768xf32, #tpu.memory_space<vmem>>, vector<8x768xf32>
    tpu.vector_store %arg9[%c64_132, %c0_133], %104 {strides = array<i32>} : memref<73x768xf32, #tpu.memory_space<vmem>>, vector<8x768xf32>,
    %c0_134 = arith.constant 0 : index
    %c0_135 = arith.constant 0 : index
    %106 = vector.load %arg4[%c0_134, %c0_135] : memref<8x73xf32, #tpu.memory_space<vmem>>, vector<8x73xf32>
    %c0_136 = arith.constant 0 : index
    %c0_137 = arith.constant 0 : index
    %107 = vector.load %arg9[%c0_136, %c0_137] : memref<73x768xf32, #tpu.memory_space<vmem>>, vector<73x768xf32>
    %cst_138 = arith.constant dense<0.000000e+00> : vector<8x768xf32>
    %108 = tpu.matmul %106, %107, %cst_138 {dimension_numbers = #tpu.dot_dimension_numbers<[1], [0], [0], [1], [0, 0, 1, 1], [], []>} : vector<8x73xf32>, vector<73x768xf32>, vector<8x768xf32> -> vector<8x768xf32>
    %109 = vector.broadcast %14 : vector<1x768xf32> to vector<8x768xf32>
    %110 = arith.mulf %108, %109 : vector<8x768xf32>
    %c0_139 = arith.constant 0 : index
    %c128_140 = arith.constant 128 : index
    %111 = vector.load %arg8[%c0_139, %c128_140] : memref<8x1024xf32, #tpu.memory_space<vmem>>, vector<8x768xf32>
    tpu.vector_store %arg8[%c0_139, %c128_140], %110 {strides = array<i32>} : memref<8x1024xf32, #tpu.memory_space<vmem>>, vector<8x768xf32>,
    %c0_141 = arith.constant 0 : index
    %c109_142 = arith.constant 109 : index
    %112 = vector.load %arg8[%c0_141, %c109_142] : memref<8x1024xf32, #tpu.memory_space<vmem>>, vector<8x768xf32>
    %c0_143 = arith.constant 0 : index
    %c0_144 = arith.constant 0 : index
    %113 = vector.load %arg9[%c0_143, %c0_144] : memref<73x768xf32, #tpu.memory_space<vmem>>, vector<8x768xf32>
    tpu.vector_store %arg9[%c0_143, %c0_144], %112 {strides = array<i32>} : memref<73x768xf32, #tpu.memory_space<vmem>>, vector<8x768xf32>,
    %c0_145 = arith.constant 0 : index
    %c110_146 = arith.constant 110 : index
    %114 = vector.load %arg8[%c0_145, %c110_146] : memref<8x1024xf32, #tpu.memory_space<vmem>>, vector<8x768xf32>
    %c8_147 = arith.constant 8 : index
    %c0_148 = arith.constant 0 : index
    %115 = vector.load %arg9[%c8_147, %c0_148] : memref<73x768xf32, #tpu.memory_space<vmem>>, vector<8x768xf32>
    tpu.vector_store %arg9[%c8_147, %c0_148], %114 {strides = array<i32>} : memref<73x768xf32, #tpu.memory_space<vmem>>, vector<8x768xf32>,
    %c0_149 = arith.constant 0 : index
    %c111_150 = arith.constant 111 : index
    %116 = vector.load %arg8[%c0_149, %c111_150] : memref<8x1024xf32, #tpu.memory_space<vmem>>, vector<8x768xf32>
    %c16_151 = arith.constant 16 : index
    %c0_152 = arith.constant 0 : index
    %117 = vector.load %arg9[%c16_151, %c0_152] : memref<73x768xf32, #tpu.memory_space<vmem>>, vector<8x768xf32>
    tpu.vector_store %arg9[%c16_151, %c0_152], %116 {strides = array<i32>} : memref<73x768xf32, #tpu.memory_space<vmem>>, vector<8x768xf32>,
    %c0_153 = arith.constant 0 : index
    %c127_154 = arith.constant 127 : index
    %118 = vector.load %arg8[%c0_153, %c127_154] : memref<8x1024xf32, #tpu.memory_space<vmem>>, vector<8x768xf32>
    %c24_155 = arith.constant 24 : index
    %c0_156 = arith.constant 0 : index
    %119 = vector.load %arg9[%c24_155, %c0_156] : memref<73x768xf32, #tpu.memory_space<vmem>>, vector<8x768xf32>
    tpu.vector_store %arg9[%c24_155, %c0_156], %118 {strides = array<i32>} : memref<73x768xf32, #tpu.memory_space<vmem>>, vector<8x768xf32>,
    %c0_157 = arith.constant 0 : index
    %c128_158 = arith.constant 128 : index
    %120 = vector.load %arg8[%c0_157, %c128_158] : memref<8x1024xf32, #tpu.memory_space<vmem>>, vector<8x768xf32>
    %c32_159 = arith.constant 32 : index
    %c0_160 = arith.constant 0 : index
    %121 = vector.load %arg9[%c32_159, %c0_160] : memref<73x768xf32, #tpu.memory_space<vmem>>, vector<8x768xf32>
    tpu.vector_store %arg9[%c32_159, %c0_160], %120 {strides = array<i32>} : memref<73x768xf32, #tpu.memory_space<vmem>>, vector<8x768xf32>,
    %c0_161 = arith.constant 0 : index
    %c129_162 = arith.constant 129 : index
    %122 = vector.load %arg8[%c0_161, %c129_162] : memref<8x1024xf32, #tpu.memory_space<vmem>>, vector<8x768xf32>
    %c40_163 = arith.constant 40 : index
    %c0_164 = arith.constant 0 : index
    %123 = vector.load %arg9[%c40_163, %c0_164] : memref<73x768xf32, #tpu.memory_space<vmem>>, vector<8x768xf32>
    tpu.vector_store %arg9[%c40_163, %c0_164], %122 {strides = array<i32>} : memref<73x768xf32, #tpu.memory_space<vmem>>, vector<8x768xf32>,
    %c0_165 = arith.constant 0 : index
    %c145_166 = arith.constant 145 : index
    %124 = vector.load %arg8[%c0_165, %c145_166] : memref<8x1024xf32, #tpu.memory_space<vmem>>, vector<8x768xf32>
    %c48_167 = arith.constant 48 : index
    %c0_168 = arith.constant 0 : index
    %125 = vector.load %arg9[%c48_167, %c0_168] : memref<73x768xf32, #tpu.memory_space<vmem>>, vector<8x768xf32>
    tpu.vector_store %arg9[%c48_167, %c0_168], %124 {strides = array<i32>} : memref<73x768xf32, #tpu.memory_space<vmem>>, vector<8x768xf32>,
    %c0_169 = arith.constant 0 : index
    %c146_170 = arith.constant 146 : index
    %126 = vector.load %arg8[%c0_169, %c146_170] : memref<8x1024xf32, #tpu.memory_space<vmem>>, vector<8x768xf32>
    %c56_171 = arith.constant 56 : index
    %c0_172 = arith.constant 0 : index
    %127 = vector.load %arg9[%c56_171, %c0_172] : memref<73x768xf32, #tpu.memory_space<vmem>>, vector<8x768xf32>
    tpu.vector_store %arg9[%c56_171, %c0_172], %126 {strides = array<i32>} : memref<73x768xf32, #tpu.memory_space<vmem>>, vector<8x768xf32>,
    %c0_173 = arith.constant 0 : index
    %c147_174 = arith.constant 147 : index
    %128 = vector.load %arg8[%c0_173, %c147_174] : memref<8x1024xf32, #tpu.memory_space<vmem>>, vector<8x768xf32>
    %c64_175 = arith.constant 64 : index
    %c0_176 = arith.constant 0 : index
    %129 = vector.load %arg9[%c64_175, %c0_176] : memref<73x768xf32, #tpu.memory_space<vmem>>, vector<8x768xf32>
    tpu.vector_store %arg9[%c64_175, %c0_176], %128 {strides = array<i32>} : memref<73x768xf32, #tpu.memory_space<vmem>>, vector<8x768xf32>,
    %c0_177 = arith.constant 0 : index
    %c0_178 = arith.constant 0 : index
    %130 = vector.load %arg6[%c0_177, %c0_178] : memref<16x73xf32, #tpu.memory_space<vmem>>, vector<16x73xf32>
    %c0_179 = arith.constant 0 : index
    %c0_180 = arith.constant 0 : index
    %131 = vector.load %arg9[%c0_179, %c0_180] : memref<73x768xf32, #tpu.memory_space<vmem>>, vector<73x768xf32>
    %cst_181 = arith.constant dense<0.000000e+00> : vector<16x768xf32>
    %132 = tpu.matmul %130, %131, %cst_181 {dimension_numbers = #tpu.dot_dimension_numbers<[1], [0], [0], [1], [0, 0, 1, 1], [], []>} : vector<16x73xf32>, vector<73x768xf32>, vector<16x768xf32> -> vector<16x768xf32>
    %133 = vector.extract_strided_slice %132 {offsets = [0, 0], sizes = [8, 768], strides = [1, 1]} : vector<16x768xf32> to vector<8x768xf32>
    %134 = vector.extract_strided_slice %132 {offsets = [8, 0], sizes = [8, 768], strides = [1, 1]} : vector<16x768xf32> to vector<8x768xf32>
    %cst_182 = arith.constant 0.000000e+00 : f32
    %135 = vector.broadcast %cst_182 : f32 to vector<8x768xf32>
    %cst_183 = arith.constant 0.000000e+00 : f32
    %136 = vector.broadcast %cst_183 : f32 to vector<8x768xf32>
    %137 = vector.extract_strided_slice %12 {offsets = [0, 0], sizes = [1, 768], strides = [1, 1]} : vector<2x768xf32> to vector<1x768xf32>
    %138 = vector.broadcast %137 : vector<1x768xf32> to vector<8x768xf32>
    %139 = arith.mulf %86, %138 : vector<8x768xf32>
    %cst_184 = arith.constant dense<0.000000e+00> : vector<8xf32>
    %140 = vector.multi_reduction <add>, %139, %cst_184 [1] : vector<8x768xf32> to vector<8xf32>
    %141 = vector.shape_cast %140 : vector<8xf32> to vector<8x1xf32>
    %cst_185 = arith.constant 3.906250e-03 : f32
    %142 = vector.broadcast %cst_185 : f32 to vector<8x1xf32>
    %143 = arith.mulf %141, %142 : vector<8x1xf32>
    %144 = vector.broadcast %143 : vector<8x1xf32> to vector<8x768xf32>
    %145 = arith.subf %86, %144 : vector<8x768xf32>
    %146 = vector.broadcast %137 : vector<1x768xf32> to vector<8x768xf32>
    %147 = arith.mulf %145, %146 : vector<8x768xf32>
    %148 = arith.mulf %147, %147 : vector<8x768xf32>
    %cst_186 = arith.constant dense<0.000000e+00> : vector<8xf32>
    %149 = vector.multi_reduction <add>, %148, %cst_186 [1] : vector<8x768xf32> to vector<8xf32>
    %150 = vector.shape_cast %149 : vector<8xf32> to vector<8x1xf32>
    %cst_187 = arith.constant 0.00392156886 : f32
    %151 = vector.broadcast %cst_187 : f32 to vector<8x1xf32>
    %152 = arith.mulf %150, %151 : vector<8x1xf32>
    %153 = math.sqrt %152 : vector<8x1xf32>
    %154 = vector.broadcast %143 : vector<8x1xf32> to vector<8x768xf32>
    %155 = vector.broadcast %137 : vector<1x768xf32> to vector<8x768xf32>
    %156 = arith.mulf %154, %155 : vector<8x768xf32>
    %157 = arith.addf %135, %156 : vector<8x768xf32>
    %158 = vector.broadcast %153 : vector<8x1xf32> to vector<8x768xf32>
    %159 = vector.broadcast %137 : vector<1x768xf32> to vector<8x768xf32>
    %160 = arith.mulf %158, %159 : vector<8x768xf32>
    %161 = arith.addf %136, %160 : vector<8x768xf32>
    %162 = vector.extract_strided_slice %12 {offsets = [1, 0], sizes = [1, 768], strides = [1, 1]} : vector<2x768xf32> to vector<1x768xf32>
    %163 = vector.broadcast %162 : vector<1x768xf32> to vector<8x768xf32>
    %164 = arith.mulf %86, %163 : vector<8x768xf32>
    %cst_188 = arith.constant dense<0.000000e+00> : vector<8xf32>
    %165 = vector.multi_reduction <add>, %164, %cst_188 [1] : vector<8x768xf32> to vector<8xf32>
    %166 = vector.shape_cast %165 : vector<8xf32> to vector<8x1xf32>
    %cst_189 = arith.constant 3.906250e-03 : f32
    %167 = vector.broadcast %cst_189 : f32 to vector<8x1xf32>
    %168 = arith.mulf %166, %167 : vector<8x1xf32>
    %169 = vector.broadcast %168 : vector<8x1xf32> to vector<8x768xf32>
    %170 = arith.subf %86, %169 : vector<8x768xf32>
    %171 = vector.broadcast %162 : vector<1x768xf32> to vector<8x768xf32>
    %172 = arith.mulf %170, %171 : vector<8x768xf32>
    %173 = arith.mulf %172, %172 : vector<8x768xf32>
    %cst_190 = arith.constant dense<0.000000e+00> : vector<8xf32>
    %174 = vector.multi_reduction <add>, %173, %cst_190 [1] : vector<8x768xf32> to vector<8xf32>
    %175 = vector.shape_cast %174 : vector<8xf32> to vector<8x1xf32>
    %cst_191 = arith.constant 0.00392156886 : f32
    %176 = vector.broadcast %cst_191 : f32 to vector<8x1xf32>
    %177 = arith.mulf %175, %176 : vector<8x1xf32>
    %178 = math.sqrt %177 : vector<8x1xf32>
    %179 = vector.broadcast %168 : vector<8x1xf32> to vector<8x768xf32>
    %180 = vector.broadcast %162 : vector<1x768xf32> to vector<8x768xf32>
    %181 = arith.mulf %179, %180 : vector<8x768xf32>
    %182 = arith.addf %157, %181 : vector<8x768xf32>
    %183 = vector.broadcast %178 : vector<8x1xf32> to vector<8x768xf32>
    %184 = vector.broadcast %162 : vector<1x768xf32> to vector<8x768xf32>
    %185 = arith.mulf %183, %184 : vector<8x768xf32>
    %186 = arith.addf %161, %185 : vector<8x768xf32>
    %187 = arith.addf %133, %186 : vector<8x768xf32>
    %188 = arith.mulf %61, %187 : vector<8x768xf32>
    %189 = arith.addf %134, %182 : vector<8x768xf32>
    %190 = arith.addf %188, %189 : vector<8x768xf32>
    %c0_192 = arith.constant 0 : index
    %c0_193 = arith.constant 0 : index
    %191 = vector.load %arg7[%c0_192, %c0_193] : memref<8x768xf32, #tpu.memory_space<vmem>>, vector<8x768xf32>
    tpu.vector_store %arg7[%c0_192, %c0_193], %190 {strides = array<i32>} : memref<8x768xf32, #tpu.memory_space<vmem>>, vector<8x768xf32>,
    return
  }
}

</mosaic_0001>

<bundles_post_ra>
// kernel: feature_linear_enhancement.1
= control target key start
LH: loop header
LB: loop body
LE: loop exit
PB: predicated region body
PF: predicated region fallthrough
CT: control target
= control target key end

     0   :  { %v5015_v3 = vmov 0.0   ;;  %s3579_s30 = smov 18   ;;  %s3580_s8 = smov 19   ;;  %v30_v7 = vlaneseq  ;;  %v3586_v8 = vmov 1.0   ;;  %vm205_vm1 = vcmask 146432   ;;  %s5007_s1 = inlined_call_operand.vmem [shape: f32[8,768], index: 1, kind: input, shape index: {}]   ;;  %s5008_s0 = inlined_call_operand.vmem [shape: f32[8,768], index: 0, kind: input, shape index: {}]   ;;  %s5009_s5 = inlined_call_operand.vmem [shape: f32[8,73], index: 5, kind: input, shape index: {}]   ;;  %s5010_s3 = inlined_call_operand.vmem [shape: f32[8,73], index: 3, kind: input, shape index: {}]   ;;  %s5011_s2 = inlined_call_operand.vmem [shape: f32[2,768], index: 2, kind: input, shape index: {}]   ;;  %s5012_s4 = inlined_call_operand.vmem [shape: f32[8,73], index: 4, kind: input, shape index: {}]   ;;  %s5013_s6 = inlined_call_operand.vmem [shape: f32[16,73], index: 6, kind: input, shape index: {}]   ;;  %s5014_s7 = inlined_call_operand.vmem [shape: f32[8,768], index: 7, kind: output, shape index: {}]  }
   0x1   :  { %v3633_v0 = vld [vmem:[%s5007_s1] sm:$0xff]  ;;  %v3638_v1 = vld [vmem:[%s5007_s1 + $0x8] sm:$0xff]  ;;  %v3643_v2 = vld [vmem:[%s5007_s1 + $0x10] sm:$0xff]  ;;  %666 = vmatprep.mubr.f32.mxu0 %v5015_v3  ;;  %737 = vmatprep.mubr.f32.mxu1 %v5015_v3  ;;  %s3581_s15 = smov 17   ;;  %s3583_s16 = smov 127   ;;  %vm158_vm2 = vcmask 154624  }
   0x2   :  { %193 = vrot.lane.b32.xlu1 %v3633_v0, %s3579_s30  ;;  %146 = vrot.lane.b32.xlu0 %v3633_v0, %s3580_s8  ;;  %v3653_v4 = vld [vmem:[%s5007_s1 + $0x18] sm:$0xff]  ;;  %v3658_v5 = vld [vmem:[%s5007_s1 + $0x20] sm:$0xff]  ;;  %s3584_s17 = smov 111   ;;  %s3585_s18 = smov 110   ;;  %vm32_vm0 = vcmp.lt.s32.totalorder %v30_v7, 768  ;;  %vm252_vm3 = vcmask 138240  }
   0x3   :  { %v3663_v6 = vld [vmem:[%s5007_s1 + $0x28] sm:$0xff]  ;;  %s3582_s1 = smov 1   ;;  %38 = vst.msk [vmem:[#allocation5 + $0x1b0] ss:$8 sm:$0xf] %vm32_vm0, %v3586_v8  ;;  %s3587_s19 = smov 109  }
   0x4   :  { %35 = vst.msk [vmem:[#allocation3 + $0x1b0] ss:$8 sm:$0xf] %vm32_vm0, %v3586_v8  ;;  %36 = vst.msk [vmem:[#allocation3 + $0x1b0] ss:$8 sm:$0x30] %vm32_vm0, %v3586_v8 }
   0x5   :  { %39 = vst.msk [vmem:[#allocation5 + $0x1b0] ss:$8 sm:$0x30] %vm32_vm0, %v3586_v8  ;;  %v3766_v9 = vld [vmem:[%s5008_s0 + $0x8] sm:$0xff]  ;;  %v3771_v10 = vld [vmem:[%s5008_s0] sm:$0xff]  ;;  %v3814_v24 = vld [vmem:[%s5008_s0 + $0x10] sm:$0xff] }
   0x6   :  { %195 = vrot.lane.b32.xlu1 %v3638_v1, %s3579_s30  ;;  %148 = vrot.lane.b32.xlu0 %v3638_v1, %s3580_s8  ;;  %vm299_vm4 = vcmask 7168   ;;  %v3835_v33 = vld [vmem:[%s5008_s0 + $0x18] sm:$0xff]  ;;  %vm358_vm5 = vcmask 1039360   ;;  %vm405_vm6 = vcmask 908288   ;;  %vm452_vm7 = vcmask 900096  }
   0x7   :  { %vm499_vm8 = vcmask 891904   ;;  %vm583_vm9 = vcmask 1040384   ;;  %vm3588_vm10 = vmmov 1   ;;  %vm579_vm12 = vcmask 596992  }
   0x8   :  { %vm3940_vm11 = vmpackc.low %vm583_vm9, %vm3588_vm10  ;;  %vm75_vm13 = vcmask 1041408  }
   0xa   :  { %3557 = vrot.lane.b32.xlu1 %v5015_v3, %s3579_s30  ;;  %3552 = vrot.lane.b32.xlu0 %v5015_v3, %s3580_s8 }
   0xe   :  { %242 = vrot.lane.b32.xlu1 %v3638_v1, %s3581_s15  ;;  %240 = vrot.lane.b32.xlu0 %v3633_v0, %s3581_s15 }
  0x12   :  { %289 = vrot.lane.b32.xlu1 %v3638_v1, %s3582_s1  ;;  %287 = vrot.lane.b32.xlu0 %v3633_v0, %s3582_s1 }
  0x16   :  { %3567 = vrot.lane.b32.xlu1 %v5015_v3, %s3582_s1  ;;  %3562 = vrot.lane.b32.xlu0 %v5015_v3, %s3581_s15 }
  0x1a   :  { %348 = vrot.lane.b32.xlu1 %v3643_v2, %s3583_s16  ;;  %346 = vrot.lane.b32.xlu0 %v3638_v1, %s3583_s16 }
  0x1e   :  { %152 = vrot.lane.b32.xlu1 %v3653_v4, %s3580_s8  ;;  %150 = vrot.lane.b32.xlu0 %v3643_v2, %s3580_s8 }
  0x22   :  { %199 = vrot.lane.b32.xlu1 %v3653_v4, %s3579_s30  ;;  %197 = vrot.lane.b32.xlu0 %v3643_v2, %s3579_s30 }
  0x26   :  { %393 = vrot.lane.b32.xlu1 %v3638_v1, %s3584_s17  ;;  %344 = vrot.lane.b32.xlu0 %v3633_v0, %s3583_s16 }
  0x2a   :  { %440 = vrot.lane.b32.xlu1 %v3638_v1, %s3585_s18  ;;  %395 = vrot.lane.b32.xlu0 %v3643_v2, %s3584_s17 }
  0x2e   :  { %244 = vrot.lane.b32.xlu1 %v3643_v2, %s3581_s15  ;;  %442 = vrot.lane.b32.xlu0 %v3643_v2, %s3585_s18 }
  0x32   :  { %291 = vrot.lane.b32.xlu1 %v3643_v2, %s3582_s1  ;;  %246 = vrot.lane.b32.xlu0 %v3653_v4, %s3581_s15 }
  0x36   :  { %391 = vrot.lane.b32.xlu1 %v3633_v0, %s3584_s17  ;;  %293 = vrot.lane.b32.xlu0 %v3653_v4, %s3582_s1 }
  0x3a   :  { %487 = vrot.lane.b32.xlu1 %v3638_v1, %s3587_s19  ;;  %438 = vrot.lane.b32.xlu0 %v3633_v0, %s3585_s18 }
  0x3e   :  { %350 = vrot.lane.b32.xlu1 %v3653_v4, %s3583_s16  ;;  %489 = vrot.lane.b32.xlu0 %v3643_v2, %s3587_s19 }
  0x42   :  { %485 = vrot.lane.b32.xlu1 %v3633_v0, %s3587_s19  ;;  %352 = vrot.lane.b32.xlu0 %v3658_v5, %s3583_s16 }
  0x46   :  { %156 = vrot.lane.b32.xlu1 %v3663_v6, %s3580_s8  ;;  %154 = vrot.lane.b32.xlu0 %v3658_v5, %s3580_s8 }
  0x4a   :  { %203 = vrot.lane.b32.xlu1 %v3663_v6, %s3579_s30  ;;  %201 = vrot.lane.b32.xlu0 %v3658_v5, %s3579_s30 }
  0x4e   :  { %399 = vrot.lane.b32.xlu1 %v3658_v5, %s3584_s17  ;;  %397 = vrot.lane.b32.xlu0 %v3653_v4, %s3584_s17 }
  0x52   :  { %446 = vrot.lane.b32.xlu1 %v3658_v5, %s3585_s18  ;;  %444 = vrot.lane.b32.xlu0 %v3653_v4, %s3585_s18 }
  0x56   :  { %250 = vrot.lane.b32.xlu1 %v3663_v6, %s3581_s15  ;;  %248 = vrot.lane.b32.xlu0 %v3658_v5, %s3581_s15 }
  0x5a   :  { %297 = vrot.lane.b32.xlu1 %v3663_v6, %s3582_s1  ;;  %295 = vrot.lane.b32.xlu0 %v3658_v5, %s3582_s1 }
  0x5e   :  { %493 = vrot.lane.b32.xlu1 %v3658_v5, %s3587_s19  ;;  %491 = vrot.lane.b32.xlu0 %v3653_v4, %s3587_s19 }
  0x62   :  { %356 = vrot.lane.b32.xlu1 %v5015_v3, %s3583_s16  ;;  %354 = vrot.lane.b32.xlu0 %v3663_v6, %s3583_s16 }
  0x66   :  { %899 = vrot.lane.b32.xlu1 %v3766_v9, %s3580_s8  ;;  %897 = vrot.lane.b32.xlu0 %v3771_v10, %s3580_s8 }
  0x6a   :  { %945 = vrot.lane.b32.xlu1 %v3766_v9, %s3579_s30  ;;  %943 = vrot.lane.b32.xlu0 %v3771_v10, %s3579_s30 }
  0x6e   :  { %403 = vrot.lane.b32.xlu1 %v5015_v3, %s3584_s17  ;;  %401 = vrot.lane.b32.xlu0 %v3663_v6, %s3584_s17 }
  0x72   :  { %450 = vrot.lane.b32.xlu1 %v5015_v3, %s3585_s18  ;;  %448 = vrot.lane.b32.xlu0 %v3663_v6, %s3585_s18 }
  0x74   :  { %v194_v11 = vpop.permute.xlu1 %193  ;;  %v147_v12 = vpop.permute.xlu0 %146 }
  0x76   :  { %991 = vrot.lane.b32.xlu1 %v3766_v9, %s3581_s15  ;;  %989 = vrot.lane.b32.xlu0 %v3771_v10, %s3581_s15 }
  0x78   :  { %v196_v13 = vpop.permute.xlu1 %195  ;;  %v149_v14 = vpop.permute.xlu0 %148 }
  0x79   :  { %v207_v15 = vsel %vm205_vm1, %v194_v11, %v196_v13  ;;  %v160_v16 = vsel %vm158_vm2, %v147_v12, %v149_v14 }
  0x7a   :  { %1037 = vrot.lane.b32.xlu1 %v3766_v9, %s3582_s1  ;;  %1035 = vrot.lane.b32.xlu0 %v3771_v10, %s3582_s1  ;;  %v3275_v17 = vpack.c.bf16 %v207_v15, %v160_v16  ;;  %v3913_v15 = vld [vmem:[%s5008_s0 + $0x20] sm:$0xff] }
  0x7c   :  { %v3799_v18 = vpop.permute.xlu1 %3557  ;;  %v3801_v19 = vpop.permute.xlu0 %3552  ;;  %3276 = vmatprep.subr.bf16.mxu0 %v3275_v17 }
  0x7d   :  { %v3559_v20 = vunpack.i.l.bf16 %v3799_v18  ;;  %v3554_v21 = vunpack.i.l.bf16 %v3801_v19 }
  0x7e   :  { %497 = vrot.lane.b32.xlu1 %v5015_v3, %s3587_s19  ;;  %495 = vrot.lane.b32.xlu0 %v3663_v6, %s3587_s19 }
  0x7f   :  { %v206_v22 = vsel %vm205_vm1, %v3559_v20, %v194_v11  ;;  %v159_v23 = vsel %vm158_vm2, %v3554_v21, %v147_v12 }
  0x80   :  { %v3816_v25 = vpop.permute.xlu1 %242  ;;  %v241_v26 = vpop.permute.xlu0 %240  ;;  %v3277_v27 = vpack.c.bf16 %v206_v22, %v159_v23  ;;  %v3927_v23 = vld [vmem:[%s5008_s0 + $0x28] sm:$0xff] }
  0x81   :  { %v254_v28 = vsel %vm252_vm3, %v241_v26, %v3816_v25 }
  0x82   :  { %1095 = vrot.lane.b32.xlu1 %v3814_v24, %s3583_s16  ;;  %1093 = vrot.lane.b32.xlu0 %v3766_v9, %s3583_s16 }
  0x83   :  { %3278 = vmatpush1.bf16.msra.mxu0 %v3277_v27 }
  0x84   :  { %v3824_v29 = vpop.permute.xlu1 %289  ;;  %v288_v30 = vpop.permute.xlu0 %287 }
  0x85   :  { %v301_v31 = vsel %vm299_vm4, %v288_v30, %v3824_v29 }
  0x86   :  { %901 = vrot.lane.b32.xlu1 %v3814_v24, %s3580_s8  ;;  %1091 = vrot.lane.b32.xlu0 %v3771_v10, %s3583_s16  ;;  %v3279_v32 = vpack.c.bf16 %v301_v31, %v254_v28 }
  0x88   :  { %v3837_v34 = vpop.permute.xlu1 %3567  ;;  %v3839_v35 = vpop.permute.xlu0 %3562  ;;  %3280 = vmatprep.subr.bf16.mxu0 %v3279_v32 }
  0x89   :  { %v3569_v36 = vunpack.i.l.bf16 %v3837_v34  ;;  %v3564_v37 = vunpack.i.l.bf16 %v3839_v35 }
  0x8a   :  { %947 = vrot.lane.b32.xlu1 %v3814_v24, %s3579_s30  ;;  %903 = vrot.lane.b32.xlu0 %v3835_v33, %s3580_s8 }
  0x8b   :  { %v300_v38 = vsel %vm299_vm4, %v3569_v36, %v288_v30  ;;  %v253_v39 = vsel %vm252_vm3, %v3564_v37, %v241_v26  ;;  %v574_v30 = vld [vmem:[#allocation5 + $0x1b8] sm:$0x1] }
  0x8c   :  { %v3849_v40 = vpop.permute.xlu1 %348  ;;  %v347_v41 = vpop.permute.xlu0 %346  ;;  %v3281_v42 = vpack.c.bf16 %v300_v38, %v253_v39 }
  0x8d   :  { %v360_v43 = vsel %vm358_vm5, %v347_v41, %v3849_v40 }
  0x8e   :  { %1139 = vrot.lane.b32.xlu1 %v3766_v9, %s3584_s17  ;;  %949 = vrot.lane.b32.xlu0 %v3835_v33, %s3579_s30  ;;  %v3283_v44 = vpack.c.bf16 %v360_v43, %v3638_v1 }
  0x8f   :  { %3282 = vmatpush1.bf16.msra.mxu0 %v3281_v42 }
  0x90   :  { %v3858_v45 = vpop.permute.xlu1 %152  ;;  %v151_v46 = vpop.permute.xlu0 %150  ;;  %3284 = vmatprep.subr.bf16.mxu0 %v3283_v44 }
  0x91   :  { %v161_v47 = vsel %vm158_vm2, %v149_v14, %v151_v46  ;;  %v162_v48 = vsel %vm158_vm2, %v151_v46, %v3858_v45 }
  0x92   :  { %1185 = vrot.lane.b32.xlu1 %v3766_v9, %s3585_s18  ;;  %1141 = vrot.lane.b32.xlu0 %v3814_v24, %s3584_s17 }
  0x94   :  { %v3867_v49 = vpop.permute.xlu1 %199  ;;  %v198_v50 = vpop.permute.xlu0 %197 }
  0x95   :  { %v208_v51 = vsel %vm205_vm1, %v196_v13, %v198_v50  ;;  %v209_v52 = vsel %vm205_vm1, %v198_v50, %v3867_v49 }
  0x96   :  { %1137 = vrot.lane.b32.xlu1 %v3771_v10, %s3584_s17  ;;  %1187 = vrot.lane.b32.xlu0 %v3814_v24, %s3585_s18  ;;  %v3297_v53 = vpack.c.bf16 %v209_v52, %v162_v48  ;;  %v3299_v54 = vpack.c.bf16 %v208_v51, %v161_v47  ;;  %v3966_v52 = vld [vmem:[%s5009_s5] sm:$0xff] }
  0x98   :  { %v394_v55 = vpop.permute.xlu1 %393  ;;  %v345_v56 = vpop.permute.xlu0 %344  ;;  %3298 = vmatprep.subr.bf16.mxu1 %v3297_v53 }
  0x99   :  { %v359_v57 = vsel %vm358_vm5, %v345_v56, %v347_v41  ;;  %3300 = vmatpush1.bf16.msra.mxu1 %v3299_v54  ;;  %v573_v41 = vld [vmem:[#allocation5 + $0x1b0] sm:$0x1] }
  0x9a   :  { %993 = vrot.lane.b32.xlu1 %v3814_v24, %s3581_s15  ;;  %1183 = vrot.lane.b32.xlu0 %v3771_v10, %s3585_s18  ;;  %v3285_v58 = vpack.c.bf16 %v359_v57, %v3633_v0 }
  0x9c   :  { %v441_v59 = vpop.permute.xlu1 %440  ;;  %v3882_v60 = vpop.permute.xlu0 %395  ;;  %3286 = vmatpush1.bf16.msra.mxu0 %v3285_v58 }
  0x9d   :  { %v407_v61 = vsel %vm405_vm6, %v394_v55, %v3882_v60 }
  0x9e   :  { %1039 = vrot.lane.b32.xlu1 %v3814_v24, %s3582_s1  ;;  %995 = vrot.lane.b32.xlu0 %v3835_v33, %s3581_s15 }
  0xa0   :  { %v245_v62 = vpop.permute.xlu1 %244  ;;  %v3890_v63 = vpop.permute.xlu0 %442 }
  0xa1   :  { %v255_v0 = vsel %vm252_vm3, %v3816_v25, %v245_v62  ;;  %v454_v1 = vsel %vm452_vm7, %v441_v59, %v3890_v63 }
  0xa2   :  { %1231 = vrot.lane.b32.xlu1 %v3766_v9, %s3587_s19  ;;  %1041 = vrot.lane.b32.xlu0 %v3835_v33, %s3582_s1  ;;  %v3287_v8 = vpack.c.bf16 %v454_v1, %v407_v61 }
  0xa4   :  { %v292_v11 = vpop.permute.xlu1 %291  ;;  %v3900_v12 = vpop.permute.xlu0 %246  ;;  %3288 = vmatprep.subr.bf16.mxu0 %v3287_v8 }
  0xa5   :  { %v302_v13 = vsel %vm299_vm4, %v3824_v29, %v292_v11  ;;  %v256_v14 = vsel %vm252_vm3, %v245_v62, %v3900_v12 }
  0xa6   :  { %1229 = vrot.lane.b32.xlu1 %v3771_v10, %s3587_s19  ;;  %1233 = vrot.lane.b32.xlu0 %v3814_v24, %s3587_s19  ;;  %v3303_v25 = vpack.c.bf16 %v302_v13, %v255_v0 }
  0xa8   :  { %v392_v16 = vpop.permute.xlu1 %391  ;;  %v3915_v17 = vpop.permute.xlu0 %293 }
  0xa9   :  { %v406_v20 = vsel %vm405_vm6, %v392_v16, %v394_v55  ;;  %v303_v21 = vsel %vm299_vm4, %v292_v11, %v3915_v17 }
  0xaa   :  { %1099 = vrot.lane.b32.xlu1 %v3913_v15, %s3583_s16  ;;  %1097 = vrot.lane.b32.xlu0 %v3835_v33, %s3583_s16  ;;  %v3301_v22 = vpack.c.bf16 %v303_v21, %v256_v14 }
  0xac   :  { %v488_v26 = vpop.permute.xlu1 %487  ;;  %v439_v27 = vpop.permute.xlu0 %438  ;;  %3302 = vmatprep.subr.bf16.mxu1 %v3301_v22 }
  0xad   :  { %v453_v28 = vsel %vm452_vm7, %v439_v27, %v441_v59  ;;  %3304 = vmatpush1.bf16.msra.mxu1 %v3303_v25  ;;  %v576_v27 = vld [vmem:[#allocation5 + $0x1c8] sm:$0x1] }
  0xae   :  { %907 = vrot.lane.b32.xlu1 %v3927_v23, %s3580_s8  ;;  %905 = vrot.lane.b32.xlu0 %v3913_v15, %s3580_s8  ;;  %v3289_v29 = vpack.c.bf16 %v453_v28, %v406_v20  ;;  %v575_v28 = vld [vmem:[#allocation5 + $0x1c0] sm:$0x1] }
  0xb0   :  { %v351_v31 = vpop.permute.xlu1 %350  ;;  %v3934_v32 = vpop.permute.xlu0 %489  ;;  %3290 = vmatpush1.bf16.msra.mxu0 %v3289_v29 }
  0xb1   :  { %v361_v36 = vsel %vm358_vm5, %v3849_v40, %v351_v31  ;;  %v501_v37 = vsel %vm499_vm8, %v488_v26, %v3934_v32 }
  0xb2   :  { %953 = vrot.lane.b32.xlu1 %v3927_v23, %s3579_s30  ;;  %951 = vrot.lane.b32.xlu0 %v3913_v15, %s3579_s30  ;;  %v3291_v39 = vpack.c.bf16 %v574_v30, %v501_v37  ;;  %v3307_v48 = vpack.c.bf16 %v361_v36, %v3643_v2 }
  0xb4   :  { %v486_v42 = vpop.permute.xlu1 %485  ;;  %v3948_v43 = vpop.permute.xlu0 %352  ;;  %3293 = vmatprep.subr.msk.bf16.mxu0 %vm3940_vm11, %v3291_v39 }
  0xb5   :  { %v500_v40 = vsel %vm499_vm8, %v486_v42, %v488_v26  ;;  %v362_v44 = vsel %vm358_vm5, %v351_v31, %v3948_v43 }
  0xb6   :  { %1145 = vrot.lane.b32.xlu1 %v3913_v15, %s3584_s17  ;;  %1143 = vrot.lane.b32.xlu0 %v3835_v33, %s3584_s17  ;;  %v3305_v46 = vpack.c.bf16 %v362_v44, %v3653_v4  ;;  %v3294_v47 = vpack.c.bf16 %v573_v41, %v500_v40 }
  0xb8   :  { %v157_v50 = vpop.permute.xlu1 %156  ;;  %v155_v51 = vpop.permute.xlu0 %154  ;;  %3306 = vmatprep.subr.bf16.mxu1 %v3305_v46  ;;  %3296 = vmatpush1.bf16.msk.msra.mxu0 %vm3940_vm11, %v3294_v47 }
  0xb9   :  { %v163_v53 = vsel %vm158_vm2, %v3858_v45, %v155_v51  ;;  %v164_v4 = vsel %vm158_vm2, %v155_v51, %v157_v50  ;;  %3308 = vmatpush1.bf16.msra.mxu1 %v3307_v48 }
  0xba   :  { %1191 = vrot.lane.b32.xlu1 %v3913_v15, %s3585_s18  ;;  %1189 = vrot.lane.b32.xlu0 %v3835_v33, %s3585_s18 }
  0xbb   :  { %3238 = vmatmul.mubr.msk.f32.vlgmr.msra.gmra.mrb[0].mxu0 %vm579_vm12, %v3966_v52 }
  0xbc   :  { %v204_v2 = vpop.permute.xlu1 %203  ;;  %v202_v54 = vpop.permute.xlu0 %201  ;;  %808 = vmatprep.mubr.f32.mxu0 %v5015_v3 }
  0xbd   :  { %v210_v55 = vsel %vm205_vm1, %v3867_v49, %v202_v54  ;;  %v211_v45 = vsel %vm205_vm1, %v202_v54, %v204_v2 }
  0xbe   :  { %999 = vrot.lane.b32.xlu1 %v3927_v23, %s3581_s15  ;;  %997 = vrot.lane.b32.xlu0 %v3913_v15, %s3581_s15  ;;  %v3319_v56 = vpack.c.bf16 %v211_v45, %v164_v4  ;;  %v3321_v57 = vpack.c.bf16 %v210_v55, %v163_v53 }
  0xc0   :  { %v3985_v58 = vpop.permute.xlu1 %399  ;;  %v398_v59 = vpop.permute.xlu0 %397  ;;  %3320 = vmatprep.subr.bf16.mxu0 %v3319_v56 }
  0xc1   :  { %v408_v61 = vsel %vm405_vm6, %v3882_v60, %v398_v59  ;;  %v409_v49 = vsel %vm405_vm6, %v398_v59, %v3985_v58  ;;  %3322 = vmatpush1.bf16.msra.mxu0 %v3321_v57 }
  0xc2   :  { %1045 = vrot.lane.b32.xlu1 %v3927_v23, %s3582_s1  ;;  %1043 = vrot.lane.b32.xlu0 %v3913_v15, %s3582_s1 }
  0xc4   :  { %v3995_v62 = vpop.permute.xlu1 %446  ;;  %v445_v0 = vpop.permute.xlu0 %444 }
  0xc5   :  { %v455_v1 = vsel %vm452_vm7, %v3890_v63, %v445_v0  ;;  %v456_v8 = vsel %vm452_vm7, %v445_v0, %v3995_v62 }
  0xc6   :  { %1237 = vrot.lane.b32.xlu1 %v3913_v15, %s3587_s19  ;;  %1235 = vrot.lane.b32.xlu0 %v3835_v33, %s3587_s19  ;;  %v3309_v60 = vpack.c.bf16 %v456_v8, %v409_v49  ;;  %v3311_v11 = vpack.c.bf16 %v455_v1, %v408_v61 }
  0xc8   :  { %v251_v13 = vpop.permute.xlu1 %250  ;;  %v249_v14 = vpop.permute.xlu0 %248  ;;  %3310 = vmatprep.subr.bf16.mxu1 %v3309_v60  ;;  %v3565_v60 = vunpack.i.h.bf16 %v3839_v35 }
  0xc9   :  { %v257_v16 = vsel %vm252_vm3, %v3900_v12, %v249_v14  ;;  %v258_v20 = vsel %vm252_vm3, %v249_v14, %v251_v13  ;;  %3312 = vmatpush1.bf16.msra.mxu1 %v3311_v11 }
  0xca   :  { %1103 = vrot.lane.b32.xlu1 %v5015_v3, %s3583_s16  ;;  %1101 = vrot.lane.b32.xlu0 %v3927_v23, %s3583_s16 }
  0xcc   :  { %v298_v63 = vpop.permute.xlu1 %297  ;;  %v296_v21 = vpop.permute.xlu0 %295 }
  0xcd   :  { %v304_v22 = vsel %vm299_vm4, %v3915_v17, %v296_v21  ;;  %v305_v25 = vsel %vm299_vm4, %v296_v21, %v298_v63 }
  0xce   :  { %1149 = vrot.lane.b32.xlu1 %v5015_v3, %s3584_s17  ;;  %1147 = vrot.lane.b32.xlu0 %v3927_v23, %s3584_s17  ;;  %v3323_v12 = vpack.c.bf16 %v305_v25, %v258_v20  ;;  %v3325_v26 = vpack.c.bf16 %v304_v22, %v257_v16  ;;  %v578_v22 = vld [vmem:[#allocation5 + $0x1d8] sm:$0x1]  ;;  %v577_v25 = vld [vmem:[#allocation5 + $0x1d0] sm:$0x1] }
  0xd0   :  { %v4019_v29 = vpop.permute.xlu1 %493  ;;  %v492_v30 = vpop.permute.xlu0 %491  ;;  %3324 = vmatprep.subr.bf16.mxu0 %v3323_v12 }
  0xd1   :  { %v502_v31 = vsel %vm499_vm8, %v3934_v32, %v492_v30  ;;  %v503_v17 = vsel %vm499_vm8, %v492_v30, %v4019_v29  ;;  %3326 = vmatpush1.bf16.msra.mxu0 %v3325_v26 }
  0xd2   :  { %1195 = vrot.lane.b32.xlu1 %v5015_v3, %s3585_s18  ;;  %1193 = vrot.lane.b32.xlu0 %v3927_v23, %s3585_s18  ;;  %v3313_v36 = vpack.c.bf16 %v576_v27, %v503_v17  ;;  %v3316_v37 = vpack.c.bf16 %v575_v28, %v502_v31 }
  0xd4   :  { %v357_v39 = vpop.permute.xlu1 %356  ;;  %v355_v41 = vpop.permute.xlu0 %354  ;;  %3315 = vmatprep.subr.msk.bf16.mxu1 %vm3940_vm11, %v3313_v36 }
  0xd5   :  { %v363_v32 = vsel %vm358_vm5, %v3948_v43, %v355_v41  ;;  %v364_v42 = vsel %vm358_vm5, %v355_v41, %v357_v39  ;;  %3318 = vmatpush1.bf16.msk.msra.mxu1 %vm3940_vm11, %v3316_v37 }
  0xd6   :  { %1241 = vrot.lane.b32.xlu1 %v5015_v3, %s3587_s19  ;;  %1239 = vrot.lane.b32.xlu0 %v3927_v23, %s3587_s19  ;;  %v3327_v40 = vpack.c.bf16 %v364_v42, %v3663_v6  ;;  %v3329_v44 = vpack.c.bf16 %v363_v32, %v3658_v5  ;;  %v3560_v6 = vunpack.i.h.bf16 %v3799_v18  ;;  %v3555_v5 = vunpack.i.h.bf16 %v3801_v19 }
  0xd8   :  { %v4042_v46 = vpop.permute.xlu1 %899  ;;  %v898_v47 = vpop.permute.xlu0 %897  ;;  %3328 = vmatprep.subr.bf16.mxu0 %v3327_v40  ;;  %3241 = vmatmul.mubr.msk.f32.vlgmr.msra.gmra.mrb[0].mxu1 %vm579_vm12, %v3966_v52 }
  0xd9   :  { %3330 = vmatpush1.bf16.msra.mxu0 %v3329_v44  ;;  %1407 = vmatprep.mubr.f32.mxu1 %v5015_v3  ;;  %v909_v50 = vsel %vm158_vm2, %v3555_v5, %v898_v47  ;;  %v910_v51 = vsel %vm158_vm2, %v898_v47, %v4042_v46 }
  0xda   :  { %1628 = vrot.lane.b32.xlu1 %v5015_v3, %s3579_s30  ;;  %1582 = vrot.lane.b32.xlu0 %v5015_v3, %s3580_s8 }
  0xdc   :  { %v4053_v43 = vpop.permute.xlu1 %945  ;;  %v944_v48 = vpop.permute.xlu0 %943 }
  0xdd   :  { %v955_v53 = vsel %vm205_vm1, %v3560_v6, %v944_v48  ;;  %v956_v4 = vsel %vm205_vm1, %v944_v48, %v4053_v43 }
  0xde   :  { %v3341_v2 = vpack.c.bf16 %v956_v4, %v910_v51  ;;  %v3343_v54 = vpack.c.bf16 %v955_v53, %v909_v50  ;;  %1720 = vrot.lane.b32.xlu1 %v5015_v3, %s3582_s1  ;;  %1674 = vrot.lane.b32.xlu0 %v5015_v3, %s3581_s15 }
  0xe0   :  { %v404_v18 = vpop.permute.xlu1 %403  ;;  %v402_v19 = vpop.permute.xlu0 %401  ;;  %3342 = vmatprep.subr.bf16.mxu1 %v3341_v2 }
  0xe1   :  { %v410_v55 = vsel %vm405_vm6, %v3985_v58, %v402_v19  ;;  %v411_v45 = vsel %vm405_vm6, %v402_v19, %v404_v18  ;;  %3344 = vmatpush1.bf16.msra.mxu1 %v3343_v54  ;;  %v3570_v58 = vunpack.i.h.bf16 %v3837_v34 }
  0xe2   :  { %1790 = vrot.lane.b32.xlu1 %v5015_v3, %s3583_s16 }
  0xe4   :  { %v451_v56 = vpop.permute.xlu1 %450  ;;  %v449_v57 = vpop.permute.xlu0 %448 }
  0xe5   :  { %v457_v59 = vsel %vm452_vm7, %v3995_v62, %v449_v57  ;;  %v458_v61 = vsel %vm452_vm7, %v449_v57, %v451_v56 }
  0xe6   :  { %v3331_v49 = vpack.c.bf16 %v458_v61, %v411_v45  ;;  %v3333_v0 = vpack.c.bf16 %v457_v59, %v410_v55 }
  0xe8   :  { %v4073_v1 = vpop.permute.xlu1 %991  ;;  %v990_v8 = vpop.permute.xlu0 %989  ;;  %3332 = vmatprep.subr.bf16.mxu0 %v3331_v49 }
  0xe9   :  { %3334 = vmatpush1.bf16.msra.mxu0 %v3333_v0  ;;  %v1001_v14 = vsel %vm252_vm3, %v3565_v60, %v990_v8  ;;  %v1002_v62 = vsel %vm252_vm3, %v990_v8, %v4073_v1 }
  0xec   :  { %v1038_v11 = vpop.permute.xlu1 %1037  ;;  %v1036_v13 = vpop.permute.xlu0 %1035 }
  0xed   :  { %v1047_v16 = vsel %vm299_vm4, %v3570_v58, %v1036_v13  ;;  %v1048_v20 = vsel %vm299_vm4, %v1036_v13, %v1038_v11  ;;  %v1317_v13 = vld [vmem:[#allocation3 + $0x1b8] sm:$0x1] }
  0xee   :  { %v3345_v63 = vpack.c.bf16 %v1048_v20, %v1002_v62  ;;  %v3347_v21 = vpack.c.bf16 %v1047_v16, %v1001_v14  ;;  %v1316_v14 = vld [vmem:[#allocation3 + $0x1b0] sm:$0x1] }
  0xf0   :  { %v498_v12 = vpop.permute.xlu1 %497  ;;  %v496_v26 = vpop.permute.xlu0 %495  ;;  %3346 = vmatprep.subr.bf16.mxu1 %v3345_v63 }
  0xf1   :  { %v504_v34 = vsel %vm499_vm8, %v4019_v29, %v496_v26  ;;  %v505_v35 = vsel %vm499_vm8, %v496_v26, %v498_v12  ;;  %3348 = vmatpush1.bf16.msra.mxu1 %v3347_v21  ;;  %v4141_v26 = vld [vmem:[%s5010_s3] sm:$0xff] }
  0xf2   :  { %v3335_v27 = vpack.c.bf16 %v578_v22, %v505_v35  ;;  %v3338_v28 = vpack.c.bf16 %v577_v25, %v504_v34 }
  0xf4   :  { %v4085_v30 = vpop.permute.xlu1 %1095  ;;  %v1094_v31 = vpop.permute.xlu0 %1093  ;;  %3337 = vmatprep.subr.msk.bf16.mxu0 %vm3940_vm11, %v3335_v27 }
  0xf5   :  { %v1106_v17 = vsel %vm358_vm5, %v1094_v31, %v4085_v30  ;;  %3340 = vmatpush1.bf16.msk.msra.mxu0 %vm3940_vm11, %v3338_v28 }
  0xf6   :  { %v3349_v36 = vpack.c.bf16 %v1106_v17, %v3766_v9 }
  0xf8   :  { %v902_v29 = vpop.permute.xlu1 %901  ;;  %v1092_v37 = vpop.permute.xlu0 %1091  ;;  %3350 = vmatprep.subr.bf16.mxu1 %v3349_v36  ;;  %3244 = vmatmul.mubr.msk.f32.vlgmr.msra.gmra.mrb[2].mxu0 %vm579_vm12, %v3966_v52 }
  0xf9   :  { %v1105_v39 = vsel %vm358_vm5, %v1092_v37, %v1094_v31  ;;  %1478 = vmatprep.mubr.f32.mxu0 %v5015_v3  ;;  %v911_v6 = vsel %vm158_vm2, %v4042_v46, %v902_v29 }
  0xfa   :  { %v3351_v41 = vpack.c.bf16 %v1105_v39, %v3771_v10 }
  0xfc   :  { %v948_v32 = vpop.permute.xlu1 %947  ;;  %v4099_v42 = vpop.permute.xlu0 %903  ;;  %3352 = vmatpush1.bf16.msra.mxu1 %v3351_v41 }
  0xfd   :  { %v957_v40 = vsel %vm205_vm1, %v4053_v43, %v948_v32  ;;  %v912_v47 = vsel %vm158_vm2, %v902_v29, %v4099_v42 }
  0xfe   :  { %v3365_v5 = vpack.c.bf16 %v957_v40, %v911_v6 }
 0x100   :  { %v1140_v9 = vpop.permute.xlu1 %1139  ;;  %v4103_v44 = vpop.permute.xlu0 %949 }
 0x101   :  { %v958_v52 = vsel %vm205_vm1, %v948_v32, %v4103_v44 }
 0x102   :  { %v3363_v10 = vpack.c.bf16 %v958_v52, %v912_v47 }
 0x104   :  { %v1186_v48 = vpop.permute.xlu1 %1185  ;;  %v4111_v50 = vpop.permute.xlu0 %1141  ;;  %3364 = vmatprep.subr.bf16.mxu0 %v3363_v10 }
 0x105   :  { %3366 = vmatpush1.bf16.msra.mxu0 %v3365_v5  ;;  %v1152_v53 = vsel %vm405_vm6, %v1140_v9, %v4111_v50 }
 0x108   :  { %v1138_v43 = vpop.permute.xlu1 %1137  ;;  %v4113_v51 = vpop.permute.xlu0 %1187 }
 0x109   :  { %v1198_v4 = vsel %vm452_vm7, %v1186_v48, %v4113_v51  ;;  %v1151_v46 = vsel %vm405_vm6, %v1138_v43, %v1140_v9 }
 0x10a   :  { %v3353_v2 = vpack.c.bf16 %v1198_v4, %v1152_v53 }
 0x10c   :  { %v994_v54 = vpop.permute.xlu1 %993  ;;  %v1184_v18 = vpop.permute.xlu0 %1183  ;;  %3354 = vmatprep.subr.bf16.mxu1 %v3353_v2 }
 0x10d   :  { %v1197_v19 = vsel %vm452_vm7, %v1184_v18, %v1186_v48  ;;  %v1003_v8 = vsel %vm252_vm3, %v4073_v1, %v994_v54  ;;  %v1319_v18 = vld [vmem:[#allocation3 + $0x1c8] sm:$0x1] }
 0x10e   :  { %v3355_v55 = vpack.c.bf16 %v1197_v19, %v1151_v46  ;;  %v1318_v46 = vld [vmem:[#allocation3 + $0x1c0] sm:$0x1] }
 0x110   :  { %v1040_v45 = vpop.permute.xlu1 %1039  ;;  %v4121_v56 = vpop.permute.xlu0 %995  ;;  %3356 = vmatpush1.bf16.msra.mxu1 %v3355_v55 }
 0x111   :  { %v1049_v57 = vsel %vm299_vm4, %v1038_v11, %v1040_v45  ;;  %v1004_v49 = vsel %vm252_vm3, %v994_v54, %v4121_v56 }
 0x112   :  { %v3369_v60 = vpack.c.bf16 %v1049_v57, %v1003_v8 }
 0x114   :  { %v1232_v59 = vpop.permute.xlu1 %1231  ;;  %v1042_v61 = vpop.permute.xlu0 %1041 }
 0x115   :  { %v1050_v0 = vsel %vm299_vm4, %v1040_v45, %v1042_v61 }
 0x116   :  { %v3367_v58 = vpack.c.bf16 %v1050_v0, %v1004_v49 }
 0x118   :  { %v1230_v62 = vpop.permute.xlu1 %1229  ;;  %v1234_v16 = vpop.permute.xlu0 %1233  ;;  %3368 = vmatprep.subr.bf16.mxu0 %v3367_v58 }
 0x119   :  { %v1243_v20 = vsel %vm499_vm8, %v1230_v62, %v1232_v59  ;;  %v1244_v11 = vsel %vm499_vm8, %v1232_v59, %v1234_v16  ;;  %3370 = vmatpush1.bf16.msra.mxu0 %v3369_v60 }
 0x11a   :  { %v3357_v63 = vpack.c.bf16 %v1317_v13, %v1244_v11  ;;  %v3360_v21 = vpack.c.bf16 %v1316_v14, %v1243_v20 }
 0x11c   :  { %v1100_v22 = vpop.permute.xlu1 %1099  ;;  %v1098_v25 = vpop.permute.xlu0 %1097  ;;  %3359 = vmatprep.subr.msk.bf16.mxu1 %vm3940_vm11, %v3357_v63 }
 0x11d   :  { %v1107_v1 = vsel %vm358_vm5, %v4085_v30, %v1098_v25  ;;  %v1108_v12 = vsel %vm358_vm5, %v1098_v25, %v1100_v22  ;;  %3362 = vmatpush1.bf16.msk.msra.mxu1 %vm3940_vm11, %v3360_v21  ;;  %v1320_v25 = vld [vmem:[#allocation3 + $0x1d0] sm:$0x1] }
 0x11e   :  { %v3371_v34 = vpack.c.bf16 %v1108_v12, %v3835_v33  ;;  %v3373_v35 = vpack.c.bf16 %v1107_v1, %v3814_v24 }
 0x120   :  { %v908_v27 = vpop.permute.xlu1 %907  ;;  %v906_v28 = vpop.permute.xlu0 %905  ;;  %3372 = vmatprep.subr.bf16.mxu0 %v3371_v34  ;;  %3247 = vmatmul.mubr.msk.f32.vlgmr.msra.gmra.mrb[2].mxu1 %vm579_vm12, %v4141_v26 }
 0x121   :  { %3374 = vmatpush1.bf16.msra.mxu0 %v3373_v35  ;;  %1549 = vmatprep.mubr.f32.mxu1 %v5015_v3  ;;  %v913_v17 = vsel %vm158_vm2, %v4099_v42, %v906_v28  ;;  %v914_v36 = vsel %vm158_vm2, %v906_v28, %v908_v27 }
 0x124   :  { %v954_v30 = vpop.permute.xlu1 %953  ;;  %v952_v31 = vpop.permute.xlu0 %951 }
 0x125   :  { %v959_v33 = vsel %vm205_vm1, %v4103_v44, %v952_v31  ;;  %v960_v24 = vsel %vm205_vm1, %v952_v31, %v954_v30 }
 0x126   :  { %v3385_v29 = vpack.c.bf16 %v960_v24, %v914_v36  ;;  %v3387_v37 = vpack.c.bf16 %v959_v33, %v913_v17 }
 0x128   :  { %v1146_v39 = vpop.permute.xlu1 %1145  ;;  %v1144_v41 = vpop.permute.xlu0 %1143  ;;  %3386 = vmatprep.subr.bf16.mxu1 %v3385_v29  ;;  %v3589_v29 = vmov 1983009808  }
 0x129   :  { %3388 = vmatpush1.bf16.msra.mxu1 %v3387_v37  ;;  %v1153_v9 = vsel %vm405_vm6, %v4111_v50, %v1144_v41  ;;  %v1154_v42 = vsel %vm405_vm6, %v1144_v41, %v1146_v39  ;;  %v46_v37 = vunpack.c.l.s4 %v3589_v29 }
 0x12c   :  { %v1192_v32 = vpop.permute.xlu1 %1191  ;;  %v1190_v40 = vpop.permute.xlu0 %1189 }
 0x12d   :  { %v1199_v47 = vsel %vm452_vm7, %v4113_v51, %v1190_v40  ;;  %v1200_v44 = vsel %vm452_vm7, %v1190_v40, %v1192_v32 }
 0x12e   :  { %v3375_v52 = vpack.c.bf16 %v1200_v44, %v1154_v42  ;;  %v3377_v6 = vpack.c.bf16 %v1199_v47, %v1153_v9 }
 0x130   :  { %v1000_v10 = vpop.permute.xlu1 %999  ;;  %v998_v5 = vpop.permute.xlu0 %997  ;;  %3376 = vmatprep.subr.bf16.mxu0 %v3375_v52 }
 0x131   :  { %3378 = vmatpush1.bf16.msra.mxu0 %v3377_v6  ;;  %v1005_v53 = vsel %vm252_vm3, %v4121_v56, %v998_v5  ;;  %v1006_v50 = vsel %vm252_vm3, %v998_v5, %v1000_v10 }
 0x134   :  { %v1046_v48 = vpop.permute.xlu1 %1045  ;;  %v1044_v43 = vpop.permute.xlu0 %1043 }
 0x135   :  { %v1051_v4 = vsel %vm299_vm4, %v1042_v61, %v1044_v43  ;;  %v1052_v2 = vsel %vm299_vm4, %v1044_v43, %v1046_v48 }
 0x136   :  { %v3389_v51 = vpack.c.bf16 %v1052_v2, %v1006_v50  ;;  %v3391_v54 = vpack.c.bf16 %v1051_v4, %v1005_v53 }
 0x138   :  { %v1238_v19 = vpop.permute.xlu1 %1237  ;;  %v1236_v55 = vpop.permute.xlu0 %1235  ;;  %3390 = vmatprep.subr.bf16.mxu1 %v3389_v51 }
 0x139   :  { %v1245_v45 = vsel %vm499_vm8, %v1234_v16, %v1236_v55  ;;  %v1246_v57 = vsel %vm499_vm8, %v1236_v55, %v1238_v19  ;;  %3392 = vmatpush1.bf16.msra.mxu1 %v3391_v54 }
 0x13a   :  { %v3379_v59 = vpack.c.bf16 %v1319_v18, %v1246_v57  ;;  %v3382_v56 = vpack.c.bf16 %v1318_v46, %v1245_v45 }
 0x13c   :  { %v1104_v49 = vpop.permute.xlu1 %1103  ;;  %v1102_v0 = vpop.permute.xlu0 %1101  ;;  %3381 = vmatprep.subr.msk.bf16.mxu0 %vm3940_vm11, %v3379_v59 }
 0x13d   :  { %v1109_v61 = vsel %vm358_vm5, %v1100_v22, %v1102_v0  ;;  %v1110_v8 = vsel %vm358_vm5, %v1102_v0, %v1104_v49  ;;  %3384 = vmatpush1.bf16.msk.msra.mxu0 %vm3940_vm11, %v3382_v56  ;;  %v1321_v22 = vld [vmem:[#allocation3 + $0x1d8] sm:$0x1]  ;;  %v4247_v56 = vld [vmem:[%s5011_s2 + $0x8] sm:$0xf] }
 0x13e   :  { %v3393_v58 = vpack.c.bf16 %v1110_v8, %v3927_v23  ;;  %v3395_v60 = vpack.c.bf16 %v1109_v61, %v3913_v15 }
 0x140   :  { %v1150_v13 = vpop.permute.xlu1 %1149  ;;  %v1148_v14 = vpop.permute.xlu0 %1147  ;;  %3250 = vmatmul.mubr.msk.f32.vlgmr.msra.gmra.mrb[4].mxu0 %vm579_vm12, %v4141_v26  ;;  %3394 = vmatprep.subr.bf16.mxu1 %v3393_v58 }
 0x141   :  { %3396 = vmatpush1.bf16.msra.mxu1 %v3395_v60  ;;  %2094 = vmatprep.mubr.f32.mxu0 %v5015_v3  ;;  %v1156_v62 = vsel %vm405_vm6, %v1148_v14, %v1150_v13  ;;  %v1155_v11 = vsel %vm405_vm6, %v1146_v39, %v1148_v14  ;;  %v4204_v39 = vshrl.u32 %v30_v7, 7 }
 0x144   :  { %v1196_v16 = vpop.permute.xlu1 %1195  ;;  %v1194_v20 = vpop.permute.xlu0 %1193 }
 0x145   :  { %v1201_v63 = vsel %vm452_vm7, %v1192_v32, %v1194_v20  ;;  %v1202_v23 = vsel %vm452_vm7, %v1194_v20, %v1196_v16  ;;  %v4210_v32 = vld [vmem:[%s5011_s2] sm:$0xff] }
 0x146   :  { %v3397_v15 = vpack.c.bf16 %v1202_v23, %v1156_v62  ;;  %v3399_v21 = vpack.c.bf16 %v1201_v63, %v1155_v11  ;;  %v44_v4 = vcombine.high %v4210_v32, %v4210_v32 }
 0x148   :  { %v1242_v1 = vpop.permute.xlu1 %1241  ;;  %v1240_v12 = vpop.permute.xlu0 %1239  ;;  %3398 = vmatprep.subr.bf16.mxu1 %v3397_v15 }
 0x149   :  { %v1247_v34 = vsel %vm499_vm8, %v1238_v19, %v1240_v12  ;;  %v1248_v35 = vsel %vm499_vm8, %v1240_v12, %v1242_v1  ;;  %3400 = vmatpush1.bf16.msra.mxu1 %v3399_v21 }
 0x14a   :  { %v3401_v27 = vpack.c.bf16 %v1321_v22, %v1248_v35  ;;  %v3404_v28 = vpack.c.bf16 %v1320_v25, %v1247_v34 }
 0x14c   :  { %3403 = vmatprep.subr.msk.bf16.mxu1 %vm3940_vm11, %v3401_v27 }
 0x14d   :  { %3406 = vmatpush1.bf16.msk.msra.mxu1 %vm3940_vm11, %v3404_v28 }
 0x150   :  { %3253 = vmatmul.mubr.msk.f32.vlgmr.msra.gmra.mrb[4].mxu1 %vm579_vm12, %v4141_v26  ;;  %v47_v26 = vunpack.c.0.s8 %v46_v37 }
 0x151   :  { %2165 = vmatprep.mubr.f32.mxu1 %v5015_v3 }
 0x152   :  { %v50_v41 = vsub.s32 %v47_v26, %v4204_v39 }
 0x154   :  { %v51_v40 = vrot.slane %v4210_v32, %v50_v41  ;;  %v58_v46 = vrot.slane %v44_v4, %v50_v41  ;;  %v67_v0 = vrot.slane %v4247_v56, %v50_v41 }
 0x156   :  { %v76_v9 = vsel %vm75_vm13, %v51_v40, 0.0  ;;  %v59_v47 = vcombine.high %v51_v40, %v51_v40  ;;  %v90_v55 = vsel %vm75_vm13, %v58_v46, 0.0  ;;  %v104_v8 = vsel %vm75_vm13, %v67_v0, 0.0 }
 0x157   :  { %v77_v42 = vrot.slane %v76_v9, 4  ;;  %v91_v57 = vrot.slane %v90_v55, 4  ;;  %v105_v60 = vrot.slane %v104_v8, 4  ;;  %v60_v62 = vcombine.high %v58_v46, %v58_v46 }
 0x158   :  { %v83_v52 = vsel %vm75_vm13, %v59_v47, 0.0  ;;  %v68_v1 = vcombine.high %v67_v0, %v67_v0 }
 0x159   :  { %v78_v44 = vadd.f32 %v77_v42, %v76_v9  ;;  %v84_v6 = vrot.slane %v83_v52, 4  ;;  %v92_v59 = vadd.f32 %v91_v57, %v90_v55  ;;  %v106_v14 = vadd.f32 %v105_v60, %v104_v8 }
 0x15a   :  { %v97_v23 = vsel %vm75_vm13, %v60_v62, 0.0  ;;  %v111_v35 = vsel %vm75_vm13, %v68_v1, 0.0 }
 0x15b   :  { %v79_v7 = vrot.slane %v78_v44, 2  ;;  %v85_v5 = vadd.f32 %v84_v6, %v83_v52  ;;  %v93_v49 = vrot.slane %v92_v59, 2  ;;  %v107_v63 = vrot.slane %v106_v14, 2 }
 0x15c   :  { %v98_v15 = vrot.slane %v97_v23, 4  ;;  %v112_v26 = vrot.slane %v111_v35, 4 }
 0x15d   :  { %v80_v10 = vadd.f32 %v79_v7, %v78_v44  ;;  %v86_v43 = vrot.slane %v85_v5, 2  ;;  %v94_v61 = vadd.f32 %v93_v49, %v92_v59  ;;  %v108_v21 = vadd.f32 %v107_v63, %v106_v14 }
 0x15e   :  { %v99_v22 = vadd.f32 %v98_v15, %v97_v23  ;;  %v113_v40 = vadd.f32 %v112_v26, %v111_v35 }
 0x15f   :  { %v81_v48 = vrot.slane %v80_v10, 1  ;;  %v87_v50 = vadd.f32 %v86_v43, %v85_v5  ;;  %v95_v58 = vrot.slane %v94_v61, 1  ;;  %v109_v25 = vrot.slane %v108_v21, 1 }
 0x160   :  { %v100_v12 = vrot.slane %v99_v22, 2  ;;  %v114_v42 = vrot.slane %v113_v40, 2 }
 0x161   :  { %v4215_v53 = vadd.f32 %v81_v48, %v80_v10  ;;  %v88_v18 = vrot.slane %v87_v50, 1  ;;  %v4263_v13 = vadd.f32 %v95_v58, %v94_v61  ;;  %v4283_v34 = vadd.f32 %v109_v25, %v108_v21  ;;  %v1629_v10 = vpop.permute.xlu1 %1628  ;;  %v1583_v48 = vpop.permute.xlu0 %1582 }
 0x162   :  { %v101_v37 = vadd.f32 %v100_v12, %v99_v22  ;;  %v115_v44 = vadd.f32 %v114_v42, %v113_v40 }
 0x163   :  { %5026 = vst [vmem:[#allocation6_spill] sm:$0xff] %v4215_v53  ;;  %v4226_v19 = vadd.f32 %v88_v18, %v87_v50 }
 0x164   :  { %v102_v41 = vrot.slane %v101_v37, 1  ;;  %v116_v52 = vrot.slane %v115_v44, 1 }
 0x165   :  { %5027 = vst [vmem:[#allocation7_spill] sm:$0xff] %v4226_v19  ;;  %v1721_v5 = vpop.permute.xlu1 %1720  ;;  %v1675_v50 = vpop.permute.xlu0 %1674 }
 0x166   :  { %v4301_v9 = vadd.f32 %v102_v41, %v101_v37  ;;  %v4318_v7 = vadd.f32 %v116_v52, %v115_v44 }
 0x169   :  { %v4363_v43 = vpop.permute.xlu1 %1790 }
 0x18e   :  { %v4191_v30 = vpop.f32.mrb[0].mxu0 }
 0x18f   :  { %v4193_v31 = vpop.f32.mrb[1].mxu0 }
 0x1ab   :  { %v4195_v17 = vpop.f32.mrb[0].mxu1 }
 0x1ac   :  { %v4197_v36 = vpop.f32.mrb[1].mxu1 }
 0x1cb   :  { %v4199_v33 = vpop.f32.mrb[2].mxu0 }
 0x1cc   :  { %v4201_v24 = vpop.f32.mrb[3].mxu0 }
 0x1f3   :  { %v1409_v2 = vpop.f32.mrb[2].mxu1 }
 0x1f4   :  { %v4220_v51 = vmul.f32 %v1409_v2, %v4215_v53  ;;  %v1411_v54 = vpop.f32.mrb[3].mxu1 }
 0x1f5   :  { %v4234_v45 = vmul.f32 %v1411_v54, %v4226_v19 }
 0x1f6   :  { %1824 = vrot.lane.b32.xlu1 %v4220_v51, %s3584_s17  ;;  %1584 = vrot.lane.b32.xlu0 %v4220_v51, %s3580_s8 }
 0x1fa   :  { %1916 = vrot.lane.b32.xlu1 %v4220_v51, %s3587_s19  ;;  %1630 = vrot.lane.b32.xlu0 %v4220_v51, %s3579_s30 }
 0x1fe   :  { %1676 = vrot.lane.b32.xlu0 %v4220_v51, %s3581_s15  ;;  %1586 = vrot.lane.b32.xlu1 %v4234_v45, %s3580_s8 }
 0x202   :  { %1722 = vrot.lane.b32.xlu0 %v4220_v51, %s3582_s1  ;;  %1632 = vrot.lane.b32.xlu1 %v4234_v45, %s3579_s30 }
 0x206   :  { %1778 = vrot.lane.b32.xlu0 %v4220_v51, %s3583_s16  ;;  %1678 = vrot.lane.b32.xlu1 %v4234_v45, %s3581_s15 }
 0x20a   :  { %1870 = vrot.lane.b32.xlu0 %v4220_v51, %s3585_s18  ;;  %1724 = vrot.lane.b32.xlu1 %v4234_v45, %s3582_s1 }
 0x20e   :  { %1780 = vrot.lane.b32.xlu0 %v4234_v45, %s3583_s16  ;;  %1826 = vrot.lane.b32.xlu1 %v4234_v45, %s3584_s17 }
 0x212   :  { %1872 = vrot.lane.b32.xlu1 %v4234_v45, %s3585_s18 }
 0x213   :  { %v1480_v16 = vpop.f32.mrb[4].mxu0 }
 0x214   :  { %v4268_v20 = vmul.f32 %v1480_v16, %v4263_v13  ;;  %v1482_v11 = vpop.f32.mrb[5].mxu0 }
 0x215   :  { %v4308_v47 = vmul.f32 %v1482_v11, %v4301_v9 }
 0x216   :  { %1588 = vrot.lane.b32.xlu0 %v4268_v20, %s3580_s8  ;;  %1918 = vrot.lane.b32.xlu1 %v4234_v45, %s3587_s19 }
 0x21a   :  { %1634 = vrot.lane.b32.xlu0 %v4268_v20, %s3579_s30  ;;  %1782 = vrot.lane.b32.xlu1 %v4268_v20, %s3583_s16 }
 0x21e   :  { %1828 = vrot.lane.b32.xlu0 %v4268_v20, %s3584_s17  ;;  %1680 = vrot.lane.b32.xlu1 %v4268_v20, %s3581_s15 }
 0x222   :  { %1874 = vrot.lane.b32.xlu0 %v4268_v20, %s3585_s18  ;;  %1726 = vrot.lane.b32.xlu1 %v4268_v20, %s3582_s1 }
 0x223   :  { %v1551_v27 = vpop.f32.mrb[4].mxu1 }
 0x224   :  { %v4291_v28 = vmul.f32 %v1551_v27, %v4283_v34  ;;  %v1553_v29 = vpop.f32.mrb[5].mxu1 }
 0x225   :  { %v4325_v6 = vmul.f32 %v1553_v29, %v4318_v7 }
 0x226   :  { %1920 = vrot.lane.b32.xlu0 %v4268_v20, %s3587_s19  ;;  %1832 = vrot.lane.b32.xlu1 %v4291_v28, %s3584_s17 }
 0x22a   :  { %1878 = vrot.lane.b32.xlu1 %v4291_v28, %s3585_s18  ;;  %1786 = vrot.lane.b32.xlu0 %v4291_v28, %s3583_s16 }
 0x22e   :  { %1924 = vrot.lane.b32.xlu1 %v4291_v28, %s3587_s19  ;;  %1592 = vrot.lane.b32.xlu0 %v4291_v28, %s3580_s8 }
 0x232   :  { %1590 = vrot.lane.b32.xlu1 %v4308_v47, %s3580_s8  ;;  %1638 = vrot.lane.b32.xlu0 %v4291_v28, %s3579_s30 }
 0x236   :  { %1636 = vrot.lane.b32.xlu1 %v4308_v47, %s3579_s30  ;;  %1684 = vrot.lane.b32.xlu0 %v4291_v28, %s3581_s15 }
 0x23a   :  { %1784 = vrot.lane.b32.xlu1 %v4308_v47, %s3583_s16  ;;  %1730 = vrot.lane.b32.xlu0 %v4291_v28, %s3582_s1 }
 0x23e   :  { %1682 = vrot.lane.b32.xlu0 %v4308_v47, %s3581_s15  ;;  %1594 = vrot.lane.b32.xlu1 %v4325_v6, %s3580_s8 }
 0x242   :  { %1728 = vrot.lane.b32.xlu0 %v4308_v47, %s3582_s1  ;;  %1640 = vrot.lane.b32.xlu1 %v4325_v6, %s3579_s30 }
 0x246   :  { %1830 = vrot.lane.b32.xlu0 %v4308_v47, %s3584_s17  ;;  %1686 = vrot.lane.b32.xlu1 %v4325_v6, %s3581_s15 }
 0x24a   :  { %1876 = vrot.lane.b32.xlu0 %v4308_v47, %s3585_s18  ;;  %1732 = vrot.lane.b32.xlu1 %v4325_v6, %s3582_s1 }
 0x24e   :  { %1922 = vrot.lane.b32.xlu0 %v4308_v47, %s3587_s19  ;;  %1836 = vrot.lane.b32.xlu1 %v5015_v3, %s3584_s17 }
 0x252   :  { %1788 = vrot.lane.b32.xlu0 %v4325_v6, %s3583_s16  ;;  %1882 = vrot.lane.b32.xlu1 %v5015_v3, %s3585_s18 }
 0x256   :  { %1834 = vrot.lane.b32.xlu0 %v4325_v6, %s3584_s17  ;;  %1928 = vrot.lane.b32.xlu1 %v5015_v3, %s3587_s19 }
 0x25a   :  { %1880 = vrot.lane.b32.xlu0 %v4325_v6, %s3585_s18  ;;  %2315 = vrot.lane.b32.xlu1 %v5015_v3, %s3579_s30 }
 0x25e   :  { %1926 = vrot.lane.b32.xlu0 %v4325_v6, %s3587_s19  ;;  %2407 = vrot.lane.b32.xlu1 %v5015_v3, %s3582_s1 }
 0x262   :  { %2269 = vrot.lane.b32.xlu0 %v5015_v3, %s3580_s8  ;;  %2477 = vrot.lane.b32.xlu1 %v5015_v3, %s3583_s16 }
 0x266   :  { %2361 = vrot.lane.b32.xlu0 %v5015_v3, %s3581_s15  ;;  %2523 = vrot.lane.b32.xlu1 %v5015_v3, %s3584_s17 }
 0x268   :  { %v1825_v4 = vpop.permute.xlu1 %1824  ;;  %v1585_v2 = vpop.permute.xlu0 %1584 }
 0x269   :  { %v1596_v8 = vsel %vm158_vm2, %v1583_v48, %v1585_v2 }
 0x26c   :  { %v1917_v54 = vpop.permute.xlu1 %1916  ;;  %v1631_v18 = vpop.permute.xlu0 %1630 }
 0x26d   :  { %v1642_v57 = vsel %vm205_vm1, %v1629_v10, %v1631_v18 }
 0x26e   :  { %v3409_v60 = vpack.c.bf16 %v1642_v57, %v1596_v8 }
 0x270   :  { %v1677_v46 = vpop.permute.xlu0 %1676  ;;  %v4373_v55 = vpop.permute.xlu1 %1586 }
 0x271   :  { %v1597_v0 = vsel %vm158_vm2, %v1585_v2, %v4373_v55  ;;  %v1688_v15 = vsel %vm252_vm3, %v1675_v50, %v1677_v46 }
 0x274   :  { %v1723_v59 = vpop.permute.xlu0 %1722  ;;  %v4376_v49 = vpop.permute.xlu1 %1632 }
 0x275   :  { %v1643_v61 = vsel %vm205_vm1, %v1631_v18, %v4376_v49  ;;  %v1734_v16 = vsel %vm299_vm4, %v1721_v5, %v1723_v59 }
 0x276   :  { %v3407_v58 = vpack.c.bf16 %v1643_v61, %v1597_v0  ;;  %v3413_v25 = vpack.c.bf16 %v1734_v16, %v1688_v15  ;;  %v2004_v0 = vld [vmem:[#allocation3 + $0x1b8] sm:$0x1] }
 0x278   :  { %v1779_v14 = vpop.permute.xlu0 %1778  ;;  %v4383_v62 = vpop.permute.xlu1 %1678  ;;  %3408 = vmatprep.subr.bf16.mxu0 %v3407_v58 }
 0x279   :  { %3410 = vmatpush1.bf16.msra.mxu0 %v3409_v60  ;;  %v1689_v63 = vsel %vm252_vm3, %v1677_v46, %v4383_v62  ;;  %v2003_v60 = vld [vmem:[#allocation3 + $0x1b0] sm:$0x1] }
 0x27c   :  { %v4386_v11 = vpop.permute.xlu1 %1724  ;;  %v1871_v21 = vpop.permute.xlu0 %1870 }
 0x27d   :  { %v1735_v23 = vsel %vm299_vm4, %v1723_v59, %v4386_v11 }
 0x27e   :  { %v3411_v22 = vpack.c.bf16 %v1735_v23, %v1689_v63 }
 0x280   :  { %v1827_v1 = vpop.permute.xlu1 %1826  ;;  %3412 = vmatprep.subr.bf16.mxu0 %v3411_v22  ;;  %v1781_v12 = vpop.permute.xlu0 %1780 }
 0x281   :  { %3414 = vmatpush1.bf16.msra.mxu0 %v3413_v25  ;;  %v1792_v37 = vsel %vm358_vm5, %v1779_v14, %v1781_v12  ;;  %v1838_v46 = vsel %vm405_vm6, %v1825_v4, %v1827_v1 }
 0x282   :  { %v3417_v44 = vpack.c.bf16 %v1792_v37, %v4220_v51 }
 0x284   :  { %v1873_v35 = vpop.permute.xlu1 %1872 }
 0x285   :  { %v1884_v5 = vsel %vm452_vm7, %v1871_v21, %v1873_v35 }
 0x286   :  { %v3421_v59 = vpack.c.bf16 %v1884_v5, %v1838_v46 }
 0x288   :  { %v1589_v27 = vpop.permute.xlu0 %1588  ;;  %v1919_v29 = vpop.permute.xlu1 %1918 }
 0x289   :  { %v1930_v61 = vsel %vm499_vm8, %v1917_v54, %v1919_v29  ;;  %v4428_v54 = vld [vmem:[%s5012_s4] sm:$0xff] }
 0x28a   :  { %v3426_v63 = vpack.c.bf16 %v2003_v60, %v1930_v61 }
 0x28c   :  { %v1635_v26 = vpop.permute.xlu0 %1634  ;;  %v4394_v41 = vpop.permute.xlu1 %1782 }
 0x28d   :  { %v1793_v40 = vsel %vm358_vm5, %v1781_v12, %v4394_v41 }
 0x28e   :  { %v3415_v42 = vpack.c.bf16 %v1793_v40, %v4234_v45  ;;  %v1598_v40 = vsel %vm158_vm2, %v4373_v55, %v1589_v27 }
 0x290   :  { %v4400_v52 = vpop.permute.xlu0 %1828  ;;  %v1681_v10 = vpop.permute.xlu1 %1680  ;;  %3416 = vmatprep.subr.bf16.mxu0 %v3415_v42 }
 0x291   :  { %3418 = vmatpush1.bf16.msra.mxu0 %v3417_v44  ;;  %v1839_v2 = vsel %vm405_vm6, %v1827_v1, %v4400_v52  ;;  %v1644_v1 = vsel %vm205_vm1, %v4376_v49, %v1635_v26 }
 0x292   :  { %v3431_v44 = vpack.c.bf16 %v1644_v1, %v1598_v40 }
 0x294   :  { %v4403_v48 = vpop.permute.xlu0 %1874  ;;  %v1727_v50 = vpop.permute.xlu1 %1726 }
 0x295   :  { %v1885_v18 = vsel %vm452_vm7, %v1873_v35, %v4403_v48  ;;  %v1736_v49 = vsel %vm299_vm4, %v4386_v11, %v1727_v50 }
 0x296   :  { %v3419_v57 = vpack.c.bf16 %v1885_v18, %v1839_v2 }
 0x298   :  { %v4411_v8 = vpop.permute.xlu0 %1920  ;;  %v4413_v58 = vpop.permute.xlu1 %1832  ;;  %3420 = vmatprep.subr.bf16.mxu0 %v3419_v57 }
 0x299   :  { %v1931_v14 = vsel %vm499_vm8, %v1919_v29, %v4411_v8  ;;  %3422 = vmatpush1.bf16.msra.mxu0 %v3421_v59 }
 0x29a   :  { %v3423_v16 = vpack.c.bf16 %v2004_v0, %v1931_v14  ;;  %v1690_v14 = vsel %vm252_vm3, %v4383_v62, %v1681_v10 }
 0x29b   :  { %v3435_v1 = vpack.c.bf16 %v1736_v49, %v1690_v14 }
 0x29c   :  { %v4417_v23 = vpop.permute.xlu1 %1878  ;;  %v4419_v4 = vpop.permute.xlu0 %1786  ;;  %3425 = vmatprep.subr.msk.bf16.mxu0 %vm3940_vm11, %v3423_v16 }
 0x29d   :  { %3428 = vmatpush1.bf16.msk.msra.mxu0 %vm3940_vm11, %v3426_v63 }
 0x2a0   :  { %v4430_v15 = vpop.permute.xlu1 %1924  ;;  %v1593_v21 = vpop.permute.xlu0 %1592  ;;  %3256 = vmatmul.mubr.msk.f32.vlgmr.msra.gmra.mrb[6].mxu0 %vm579_vm12, %v4428_v54 }
 0x2a1   :  { %2236 = vmatprep.mubr.f32.mxu0 %v5015_v3 }
 0x2a4   :  { %v1591_v22 = vpop.permute.xlu1 %1590  ;;  %v1639_v25 = vpop.permute.xlu0 %1638 }
 0x2a5   :  { %v1599_v29 = vsel %vm158_vm2, %v1589_v27, %v1591_v22  ;;  %v1600_v11 = vsel %vm158_vm2, %v1591_v22, %v1593_v21 }
 0x2a8   :  { %v1637_v12 = vpop.permute.xlu1 %1636  ;;  %v1685_v35 = vpop.permute.xlu0 %1684 }
 0x2a9   :  { %v1645_v37 = vsel %vm205_vm1, %v1635_v26, %v1637_v12  ;;  %v1646_v57 = vsel %vm205_vm1, %v1637_v12, %v1639_v25 }
 0x2aa   :  { %v3429_v42 = vpack.c.bf16 %v1645_v37, %v1599_v29  ;;  %v3453_v12 = vpack.c.bf16 %v1646_v57, %v1600_v11 }
 0x2ac   :  { %v1785_v5 = vpop.permute.xlu1 %1784  ;;  %v1731_v2 = vpop.permute.xlu0 %1730  ;;  %3430 = vmatprep.subr.bf16.mxu1 %v3429_v42 }
 0x2ad   :  { %3432 = vmatpush1.bf16.msra.mxu1 %v3431_v44  ;;  %v1795_v59 = vsel %vm358_vm5, %v1785_v5, %v4419_v4  ;;  %v1794_v29 = vsel %vm358_vm5, %v4394_v41, %v1785_v5 }
 0x2ae   :  { %v3439_v62 = vpack.c.bf16 %v1794_v29, %v4268_v20 }
 0x2b0   :  { %v1683_v18 = vpop.permute.xlu0 %1682  ;;  %v1595_v46 = vpop.permute.xlu1 %1594 }
 0x2b1   :  { %v1691_v55 = vsel %vm252_vm3, %v1681_v10, %v1683_v18  ;;  %v1601_v27 = vsel %vm158_vm2, %v1593_v21, %v1595_v46  ;;  %v1692_v49 = vsel %vm252_vm3, %v1683_v18, %v1685_v35 }
 0x2b4   :  { %v1729_v26 = vpop.permute.xlu0 %1728  ;;  %v1641_v0 = vpop.permute.xlu1 %1640 }
 0x2b5   :  { %v1737_v61 = vsel %vm299_vm4, %v1727_v50, %v1729_v26  ;;  %v1647_v60 = vsel %vm205_vm1, %v1639_v25, %v1641_v0  ;;  %v3437_v50 = vpack.c.bf16 %v1795_v59, %v4308_v47  ;;  %v1738_v10 = vsel %vm299_vm4, %v1729_v26, %v1731_v2  ;;  %v2006_v0 = vld [vmem:[#allocation3 + $0x1c8] sm:$0x1] }
 0x2b6   :  { %v3433_v16 = vpack.c.bf16 %v1737_v61, %v1691_v55  ;;  %v3451_v63 = vpack.c.bf16 %v1647_v60, %v1601_v27  ;;  %v3457_v26 = vpack.c.bf16 %v1738_v10, %v1692_v49  ;;  %v2005_v55 = vld [vmem:[#allocation3 + $0x1c0] sm:$0x1]  ;;  %v2008_v10 = vld [vmem:[#allocation3 + $0x1d8] sm:$0x1] }
 0x2b8   :  { %v1831_v37 = vpop.permute.xlu0 %1830  ;;  %v1687_v40 = vpop.permute.xlu1 %1686  ;;  %3434 = vmatprep.subr.bf16.mxu1 %v3433_v16  ;;  %3452 = vmatprep.subr.bf16.mxu0 %v3451_v63 }
 0x2b9   :  { %3436 = vmatpush1.bf16.msra.mxu1 %v3435_v1  ;;  %3454 = vmatpush1.bf16.msra.mxu0 %v3453_v12  ;;  %v1840_v21 = vsel %vm405_vm6, %v4400_v52, %v1831_v37  ;;  %v1841_v22 = vsel %vm405_vm6, %v1831_v37, %v4413_v58  ;;  %v1693_v42 = vsel %vm252_vm3, %v1685_v35, %v1687_v40 }
 0x2ba   :  { %3438 = vmatprep.subr.bf16.mxu1 %v3437_v50 }
 0x2bc   :  { %v1877_v41 = vpop.permute.xlu0 %1876  ;;  %v1733_v25 = vpop.permute.xlu1 %1732 }
 0x2bd   :  { %v1886_v44 = vsel %vm452_vm7, %v4403_v48, %v1877_v41  ;;  %v1887_v5 = vsel %vm452_vm7, %v1877_v41, %v4417_v23  ;;  %v1739_v46 = vsel %vm299_vm4, %v1731_v2, %v1733_v25  ;;  %3440 = vmatpush1.bf16.msra.mxu1 %v3439_v62 }
 0x2be   :  { %v3441_v57 = vpack.c.bf16 %v1887_v5, %v1841_v22  ;;  %v3455_v52 = vpack.c.bf16 %v1739_v46, %v1693_v42  ;;  %v3443_v59 = vpack.c.bf16 %v1886_v44, %v1840_v21  ;;  %v2007_v21 = vld [vmem:[#allocation3 + $0x1d0] sm:$0x1] }
 0x2c0   :  { %v1923_v27 = vpop.permute.xlu0 %1922  ;;  %3442 = vmatprep.subr.bf16.mxu1 %v3441_v57  ;;  %3456 = vmatprep.subr.bf16.mxu0 %v3455_v52  ;;  %v1837_v2 = vpop.permute.xlu1 %1836 }
 0x2c1   :  { %v1932_v48 = vsel %vm499_vm8, %v4411_v8, %v1923_v27  ;;  %v1933_v61 = vsel %vm499_vm8, %v1923_v27, %v4430_v15  ;;  %3444 = vmatpush1.bf16.msra.mxu1 %v3443_v59  ;;  %3458 = vmatpush1.bf16.msra.mxu0 %v3457_v26 }
 0x2c2   :  { %v3445_v60 = vpack.c.bf16 %v2006_v0, %v1933_v61  ;;  %v3448_v35 = vpack.c.bf16 %v2005_v55, %v1932_v48 }
 0x2c4   :  { %v1789_v18 = vpop.permute.xlu0 %1788  ;;  %3447 = vmatprep.subr.msk.bf16.mxu1 %vm3940_vm11, %v3445_v60  ;;  %v1883_v1 = vpop.permute.xlu1 %1882  ;;  %v3083_v60 = vsub.s32 3, %v4204_v39 }
 0x2c5   :  { %v1796_v14 = vsel %vm358_vm5, %v4419_v4, %v1789_v18  ;;  %v1797_v11 = vsel %vm358_vm5, %v1789_v18, %v4363_v43  ;;  %3450 = vmatpush1.bf16.msk.msra.mxu1 %vm3940_vm11, %v3448_v35  ;;  %v3087_v35 = vsub.s32 5, %v4204_v39 }
 0x2c6   :  { %v3459_v8 = vpack.c.bf16 %v1797_v11, %v4325_v6  ;;  %v3461_v16 = vpack.c.bf16 %v1796_v14, %v4291_v28  ;;  %v3084_v14 = vrot.slane %v4210_v32, %v3083_v60 }
 0x2c8   :  { %v1835_v63 = vpop.permute.xlu0 %1834  ;;  %3259 = vmatmul.mubr.msk.f32.vlgmr.msra.gmra.mrb[6].mxu1 %vm579_vm12, %v4428_v54  ;;  %3460 = vmatprep.subr.bf16.mxu0 %v3459_v8  ;;  %v1929_v40 = vpop.permute.xlu1 %1928 }
 0x2c9   :  { %3462 = vmatpush1.bf16.msra.mxu0 %v3461_v16  ;;  %2785 = vmatprep.mubr.f32.mxu1 %v5015_v3  ;;  %v1842_v43 = vsel %vm405_vm6, %v4413_v58, %v1835_v63  ;;  %v1843_v12 = vsel %vm405_vm6, %v1835_v63, %v1837_v2  ;;  %v3079_v2 = vsub.s32 1, %v4204_v39  ;;  %v3088_v16 = vrot.slane %v4210_v32, %v3087_v35 }
 0x2ca   :  { %v3091_v63 = vsub.s32 7, %v4204_v39 }
 0x2cb   :  { %v3080_v18 = vrot.slane %v4210_v32, %v3079_v2 }
 0x2cc   :  { %v1881_v4 = vpop.permute.xlu0 %1880  ;;  %v2316_v55 = vpop.permute.xlu1 %2315 }
 0x2cd   :  { %v1888_v29 = vsel %vm452_vm7, %v4417_v23, %v1881_v4  ;;  %v1889_v37 = vsel %vm452_vm7, %v1881_v4, %v1883_v1  ;;  %v4631_v1 = vrot.slane %v3080_v18, %v3079_v2  ;;  %v4633_v4 = vrot.slane %v3084_v14, %v3079_v2 }
 0x2ce   :  { %v3463_v50 = vpack.c.bf16 %v1889_v37, %v1843_v12  ;;  %v3465_v62 = vpack.c.bf16 %v1888_v29, %v1842_v43  ;;  %v3092_v43 = vrot.slane %v4210_v32, %v3091_v63  ;;  %v4638_v12 = vrot.slane %v3088_v16, %v3079_v2 }
 0x2cf   :  { %v4641_v29 = vsub.s32 0, %v4204_v39  ;;  %v2958_v37 = vsub.s32 2, %v4204_v39  ;;  %v2966_v18 = vsub.s32 6, %v4204_v39 }
 0x2d0   :  { %v1927_v22 = vpop.permute.xlu0 %1926  ;;  %3464 = vmatprep.subr.bf16.mxu0 %v3463_v50  ;;  %v4612_v27 = vpop.permute.xlu1 %2407 }
 0x2d1   :  { %v1934_v41 = vsel %vm499_vm8, %v4430_v15, %v1927_v22  ;;  %v1935_v25 = vsel %vm499_vm8, %v1927_v22, %v1929_v40  ;;  %3466 = vmatpush1.bf16.msra.mxu0 %v3465_v62  ;;  %v3096_v62 = vrot.slane %v4247_v56, %v3079_v2 }
 0x2d2   :  { %v3467_v58 = vpack.c.bf16 %v2008_v10, %v1935_v25  ;;  %v3470_v42 = vpack.c.bf16 %v2007_v21, %v1934_v41  ;;  %v3131_v10 = vmul.f32 %v4631_v1, %v4220_v51  ;;  %v3132_v21 = vmul.f32 %v4633_v4, %v4234_v45 }
 0x2d3   :  { %v2962_v41 = vsub.s32 4, %v4204_v39  ;;  %v4653_v25 = vrot.slane %v3092_v43, %v3079_v2 }
 0x2d4   :  { %3469 = vmatprep.subr.msk.bf16.mxu0 %vm3940_vm11, %v3467_v58  ;;  %v2270_v48 = vpop.permute.xlu0 %2269  ;;  %v4616_v61 = vpop.permute.xlu1 %2477  ;;  %v3133_v58 = vmul.f32 %v4638_v12, %v4268_v20 }
 0x2d5   :  { %3472 = vmatpush1.bf16.msk.msra.mxu0 %vm3940_vm11, %v3470_v42  ;;  %v2955_v42 = vrot.slane %v4210_v32, %v4641_v29  ;;  %v2963_v35 = vrot.slane %v4210_v32, %v2962_v41  ;;  %v3134_v14 = vmul.f32 %v4653_v25, %v4308_v47  ;;  %v2967_v41 = vrot.slane %v4210_v32, %v2966_v18 }
 0x2d7   :  { %v4671_v63 = vrot.slane %v2955_v42, %v4641_v29  ;;  %v4691_v42 = vmul.f32 %v4191_v30, %v4215_v53 }
 0x2d8   :  { %3262 = vmatmul.mubr.msk.f32.vlgmr.msra.gmra.mrb[8].mxu0 %vm579_vm12, %v4428_v54  ;;  %v2362_v11 = vpop.permute.xlu0 %2361  ;;  %v4627_v8 = vpop.permute.xlu1 %2523 }
 0x2d9   :  { %2862 = vmatprep.mubr.f32.mxu0 %v5015_v3  ;;  %5028 = vst [vmem:[#allocation8_spill] sm:$0xff] %v4671_v63 }
 0x373   :  { %v2096_v23 = vpop.f32.mrb[6].mxu0 }
 0x374   :  { %v4503_v44 = vmul.f32 %v2096_v23, %v4215_v53  ;;  %v2098_v15 = vpop.f32.mrb[7].mxu0  ;;  %v2959_v23 = vrot.slane %v4210_v32, %v2958_v37 }
 0x375   :  { %v4506_v5 = vmul.f32 %v2098_v15, %v4226_v19 }
 0x376   :  { %2271 = vrot.lane.b32.xlu0 %v4503_v44, %s3580_s8  ;;  %2511 = vrot.lane.b32.xlu1 %v4503_v44, %s3584_s17  ;;  %v4674_v43 = vrot.slane %v2959_v23, %v4641_v29 }
 0x378   :  { %5029 = vst [vmem:[#allocation9_spill] sm:$0xff] %v4674_v43  ;;  %v3007_v32 = vmul.f32 %v4674_v43, %v4234_v45 }
 0x37a   :  { %2317 = vrot.lane.b32.xlu0 %v4503_v44, %s3579_s30  ;;  %2603 = vrot.lane.b32.xlu1 %v4503_v44, %s3587_s19 }
 0x37e   :  { %2363 = vrot.lane.b32.xlu0 %v4503_v44, %s3581_s15  ;;  %2273 = vrot.lane.b32.xlu1 %v4506_v5, %s3580_s8 }
 0x382   :  { %2409 = vrot.lane.b32.xlu0 %v4503_v44, %s3582_s1  ;;  %2319 = vrot.lane.b32.xlu1 %v4506_v5, %s3579_s30 }
 0x386   :  { %2465 = vrot.lane.b32.xlu0 %v4503_v44, %s3583_s16  ;;  %2365 = vrot.lane.b32.xlu1 %v4506_v5, %s3581_s15 }
 0x38a   :  { %2557 = vrot.lane.b32.xlu0 %v4503_v44, %s3585_s18  ;;  %2411 = vrot.lane.b32.xlu1 %v4506_v5, %s3582_s1 }
 0x38e   :  { %2467 = vrot.lane.b32.xlu0 %v4506_v5, %s3583_s16  ;;  %2513 = vrot.lane.b32.xlu1 %v4506_v5, %s3584_s17 }
 0x392   :  { %2559 = vrot.lane.b32.xlu1 %v4506_v5, %s3585_s18 }
 0x396   :  { %2605 = vrot.lane.b32.xlu1 %v4506_v5, %s3587_s19 }
 0x39b   :  { %v2167_v54 = vpop.f32.mrb[6].mxu1 }
 0x39c   :  { %v4541_v46 = vmul.f32 %v2167_v54, %v4263_v13  ;;  %v2169_v49 = vpop.f32.mrb[7].mxu1 }
 0x39d   :  { %v4544_v57 = vmul.f32 %v2169_v49, %v4301_v9  ;;  %v3100_v49 = vrot.slane %v4247_v56, %v3083_v60 }
 0x39e   :  { %2515 = vrot.lane.b32.xlu0 %v4541_v46, %s3584_s17  ;;  %2469 = vrot.lane.b32.xlu1 %v4541_v46, %s3583_s16 }
 0x3a2   :  { %2561 = vrot.lane.b32.xlu0 %v4541_v46, %s3585_s18  ;;  %2277 = vrot.lane.b32.xlu1 %v4544_v57, %s3580_s8 }
 0x3a6   :  { %2607 = vrot.lane.b32.xlu0 %v4541_v46, %s3587_s19  ;;  %2323 = vrot.lane.b32.xlu1 %v4544_v57, %s3579_s30 }
 0x3aa   :  { %2275 = vrot.lane.b32.xlu0 %v4541_v46, %s3580_s8  ;;  %2369 = vrot.lane.b32.xlu1 %v4544_v57, %s3581_s15 }
 0x3ab   :  { %v2238_v52 = vpop.f32.mrb[8].mxu0 }
 0x3ac   :  { %v4563_v59 = vmul.f32 %v2238_v52, %v4283_v34  ;;  %v2240_v26 = vpop.f32.mrb[9].mxu0  ;;  %v4663_v52 = vrot.slane %v3096_v62, %v3079_v2 }
 0x3ad   :  { %v4566_v0 = vmul.f32 %v2240_v26, %v4318_v7  ;;  %v3137_v26 = vadd.f32 %v3132_v21, %v3131_v10  ;;  %v4678_v10 = vrot.slane %v3100_v49, %v3079_v2  ;;  %v4695_v2 = vmul.f32 %v4193_v31, %v4226_v19 }
 0x3ae   :  { %2321 = vrot.lane.b32.xlu0 %v4541_v46, %s3579_s30  ;;  %2415 = vrot.lane.b32.xlu1 %v4544_v57, %s3582_s1  ;;  %v4720_v19 = vmul.f32 %v4195_v17, %v4263_v13 }
 0x3af   :  { %v3138_v16 = vadd.f32 %v3137_v26, %v3133_v58  ;;  %v4687_v58 = vrot.slane %v2963_v35, %v4641_v29  ;;  %5030 = vst [vmem:[#allocation10_spill] sm:$0xff] %v4695_v2  ;;  %v3136_v30 = vmul.f32 %v4678_v10, %v4325_v6 }
 0x3b1   :  { %v3139_v23 = vadd.f32 %v3138_v16, %v3134_v14  ;;  %v4712_v14 = vrot.slane %v2967_v41, %v4641_v29  ;;  %v3008_v16 = vmul.f32 %v4687_v58, %v4268_v20 }
 0x3b2   :  { %2367 = vrot.lane.b32.xlu0 %v4541_v46, %s3581_s15  ;;  %2473 = vrot.lane.b32.xlu1 %v4563_v59, %s3583_s16 }
 0x3b3   :  { %v3009_v17 = vmul.f32 %v4712_v14, %v4308_v47 }
 0x3b6   :  { %2413 = vrot.lane.b32.xlu0 %v4541_v46, %s3582_s1  ;;  %2519 = vrot.lane.b32.xlu1 %v4563_v59, %s3584_s17 }
 0x3ba   :  { %2471 = vrot.lane.b32.xlu0 %v4544_v57, %s3583_s16  ;;  %2565 = vrot.lane.b32.xlu1 %v4563_v59, %s3585_s18 }
 0x3be   :  { %2517 = vrot.lane.b32.xlu0 %v4544_v57, %s3584_s17  ;;  %2281 = vrot.lane.b32.xlu1 %v4566_v0, %s3580_s8 }
 0x3c2   :  { %2563 = vrot.lane.b32.xlu0 %v4544_v57, %s3585_s18  ;;  %2327 = vrot.lane.b32.xlu1 %v4566_v0, %s3579_s30 }
 0x3c6   :  { %2279 = vrot.lane.b32.xlu0 %v4563_v59, %s3580_s8  ;;  %2373 = vrot.lane.b32.xlu1 %v4566_v0, %s3581_s15 }
 0x3ca   :  { %2325 = vrot.lane.b32.xlu0 %v4563_v59, %s3579_s30  ;;  %2419 = vrot.lane.b32.xlu1 %v4566_v0, %s3582_s1 }
 0x3ce   :  { %2371 = vrot.lane.b32.xlu0 %v4563_v59, %s3581_s15  ;;  %2569 = vrot.lane.b32.xlu1 %v5015_v3, %s3585_s18 }
 0x3d2   :  { %2417 = vrot.lane.b32.xlu0 %v4563_v59, %s3582_s1  ;;  %2611 = vrot.lane.b32.xlu1 %v4563_v59, %s3587_s19 }
 0x3d6   :  { %2609 = vrot.lane.b32.xlu0 %v4544_v57, %s3587_s19  ;;  %2615 = vrot.lane.b32.xlu1 %v5015_v3, %s3587_s19  ;;  %v821_v3 = vadd.f32 %v4695_v2, %v4691_v42 }
 0x3da   :  { %2475 = vrot.lane.b32.xlu0 %v4566_v0, %s3583_s16 }
 0x3de   :  { %2521 = vrot.lane.b32.xlu0 %v4566_v0, %s3584_s17 }
 0x3e2   :  { %2567 = vrot.lane.b32.xlu0 %v4566_v0, %s3585_s18 }
 0x3e6   :  { %2613 = vrot.lane.b32.xlu0 %v4566_v0, %s3587_s19 }
 0x3e8   :  { %v2272_v40 = vpop.permute.xlu0 %2271  ;;  %v4644_v50 = vpop.permute.xlu1 %2511 }
 0x3e9   :  { %v2283_v22 = vsel %vm158_vm2, %v2270_v48, %v2272_v40 }
 0x3ec   :  { %v2318_v15 = vpop.permute.xlu0 %2317  ;;  %v4660_v54 = vpop.permute.xlu1 %2603 }
 0x3ed   :  { %v2329_v48 = vsel %vm205_vm1, %v2316_v55, %v2318_v15  ;;  %v3135_v55 = vmul.f32 %v4663_v52, %v4291_v28 }
 0x3ef   :  { %v3140_v35 = vadd.f32 %v3139_v23, %v3135_v55  ;;  %v3475_v23 = vpack.c.bf16 %v2329_v48, %v2283_v22  ;;  %v822_v22 = vadd.f32 %v821_v3, %v4720_v19 }
 0x3f0   :  { %v2364_v60 = vpop.permute.xlu0 %2363  ;;  %v4676_v62 = vpop.permute.xlu1 %2273 }
 0x3f1   :  { %v2375_v39 = vsel %vm252_vm3, %v2362_v11, %v2364_v60  ;;  %v2284_v21 = vsel %vm158_vm2, %v2272_v40, %v4676_v62  ;;  %v2971_v11 = vrot.slane %v4247_v56, %v4641_v29  ;;  %v3006_v40 = vmul.f32 %v4671_v63, %v4220_v51 }
 0x3f2   :  { %v3141_v63 = vadd.f32 %v3140_v35, %v3136_v30 }
 0x3f3   :  { %v4724_v53 = vrot.slane %v2971_v11, %v4641_v29 }
 0x3f4   :  { %v2410_v49 = vpop.permute.xlu0 %2409  ;;  %v4703_v26 = vpop.permute.xlu1 %2319 }
 0x3f5   :  { %v2421_v31 = vsel %vm299_vm4, %v4612_v27, %v2410_v49  ;;  %v2330_v18 = vsel %vm205_vm1, %v2318_v15, %v4703_v26  ;;  %v2975_v27 = vrot.slane %v4247_v56, %v2958_v37  ;;  %v3012_v15 = vadd.f32 %v3007_v32, %v3006_v40 }
 0x3f6   :  { %v3473_v55 = vpack.c.bf16 %v2330_v18, %v2284_v21  ;;  %v4735_v56 = vmul.f32 %v4197_v36, %v4301_v9  ;;  %v3010_v48 = vmul.f32 %v4724_v53, %v4291_v28  ;;  %v4749_v36 = vmul.f32 %v4199_v33, %v4283_v34 }
 0x3f7   :  { %v3013_v21 = vadd.f32 %v3012_v15, %v3008_v16  ;;  %v4738_v37 = vrot.slane %v2975_v27, %v4641_v29  ;;  %v3479_v35 = vpack.c.bf16 %v2421_v31, %v2375_v39  ;;  %v4759_v33 = vmul.f32 %v4201_v24, %v4318_v7 }
 0x3f8   :  { %v2466_v41 = vpop.permute.xlu0 %2465  ;;  %v4726_v43 = vpop.permute.xlu1 %2365  ;;  %3474 = vmatprep.subr.bf16.mxu1 %v3473_v55  ;;  %v823_v3 = vadd.f32 %v822_v22, %v4735_v56 }
 0x3f9   :  { %v2376_v2 = vsel %vm252_vm3, %v2364_v60, %v4726_v43  ;;  %3476 = vmatpush1.bf16.msra.mxu1 %v3475_v23  ;;  %v3014_v32 = vadd.f32 %v3013_v21, %v3009_v17  ;;  %v3011_v29 = vmul.f32 %v4738_v37, %v4325_v6 }
 0x3fa   :  { %3142 = vadd.xlane.f32.xlu1 %v3141_v63 }
 0x3fb   :  { %v3015_v63 = vadd.f32 %v3014_v32, %v3010_v48 }
 0x3fc   :  { %v2558_v11 = vpop.permute.xlu0 %2557  ;;  %v4742_v60 = vpop.permute.xlu1 %2411 }
 0x3fd   :  { %v2422_v40 = vsel %vm299_vm4, %v2410_v49, %v4742_v60  ;;  %v3016_v23 = vadd.f32 %v3015_v63, %v3011_v29 }
 0x3fe   :  { %v3477_v30 = vpack.c.bf16 %v2422_v40, %v2376_v2  ;;  %v824_v2 = vadd.f32 %v823_v3, %v4749_v36 }
 0x400   :  { %v2468_v18 = vpop.permute.xlu0 %2467  ;;  %v2514_v16 = vpop.permute.xlu1 %2513  ;;  %3478 = vmatprep.subr.bf16.mxu1 %v3477_v30  ;;  %v825_v39 = vadd.f32 %v824_v2, %v4759_v33  ;;  %v2692_v30 = vld [vmem:[#allocation3 + $0x1b8] sm:$0x1] }
 0x401   :  { %v2479_v55 = vsel %vm358_vm5, %v2466_v41, %v2468_v18  ;;  %v2525_v49 = vsel %vm405_vm6, %v4644_v50, %v2514_v16  ;;  %3480 = vmatpush1.bf16.msra.mxu1 %v3479_v35 }
 0x402   :  { %v3483_v48 = vpack.c.bf16 %v2479_v55, %v4503_v44 }
 0x404   :  { %v2560_v27 = vpop.permute.xlu1 %2559 }
 0x405   :  { %v2571_v15 = vsel %vm452_vm7, %v2558_v11, %v2560_v27  ;;  %3017 = vadd.xlane.f32.xlu0 %v3016_v23  ;;  %v4797_v23 = vld [vmem:[%s5013_s6] sm:$0xff] }
 0x406   :  { %v3487_v3 = vpack.c.bf16 %v2571_v15, %v2525_v49 }
 0x408   :  { %v2606_v31 = vpop.permute.xlu1 %2605 }
 0x409   :  { %v2617_v41 = vsel %vm499_vm8, %v4660_v54, %v2606_v31  ;;  %826 = vadd.xlane.f32.xlu0 %v825_v39 }
 0x410   :  { %v4765_v50 = vpop.permute.xlu0 %2515  ;;  %v2470_v17 = vpop.permute.xlu1 %2469 }
 0x411   :  { %v2526_v21 = vsel %vm405_vm6, %v2514_v16, %v4765_v50  ;;  %v2480_v24 = vsel %vm358_vm5, %v2468_v18, %v2470_v17 }
 0x412   :  { %v3481_v22 = vpack.c.bf16 %v2480_v24, %v4506_v5  ;;  %v2691_v5 = vld [vmem:[#allocation3 + $0x1b0] sm:$0x1] }
 0x413   :  { %v3492_v18 = vpack.c.bf16 %v2691_v5, %v2617_v41  ;;  %v4809_v41 = vld [vmem:[%s5013_s6 + $0x8] sm:$0xff] }
 0x414   :  { %v4772_v11 = vpop.permute.xlu0 %2561  ;;  %v4774_v40 = vpop.permute.xlu1 %2277  ;;  %3482 = vmatprep.subr.bf16.mxu1 %v3481_v22 }
 0x415   :  { %v2572_v54 = vsel %vm452_vm7, %v2560_v27, %v4772_v11  ;;  %3484 = vmatpush1.bf16.msra.mxu1 %v3483_v48 }
 0x416   :  { %v3485_v32 = vpack.c.bf16 %v2572_v54, %v2526_v21 }
 0x418   :  { %v4778_v29 = vpop.permute.xlu0 %2607  ;;  %v4780_v63 = vpop.permute.xlu1 %2323  ;;  %3486 = vmatprep.subr.bf16.mxu1 %v3485_v32 }
 0x419   :  { %v2618_v44 = vsel %vm499_vm8, %v2606_v31, %v4778_v29  ;;  %3488 = vmatpush1.bf16.msra.mxu1 %v3487_v3  ;;  %v5031_v31 = vmov 0.0  }
 0x41a   :  { %v3489_v35 = vpack.c.bf16 %v2692_v30, %v2618_v44 }
 0x41c   :  { %v2276_v16 = vpop.permute.xlu0 %2275  ;;  %v4784_v55 = vpop.permute.xlu1 %2369  ;;  %3491 = vmatprep.subr.msk.bf16.mxu1 %vm3940_vm11, %v3489_v35 }
 0x41d   :  { %v2285_v49 = vsel %vm158_vm2, %v4676_v62, %v2276_v16  ;;  %v2286_v2 = vsel %vm158_vm2, %v2276_v16, %v4774_v40  ;;  %3494 = vmatpush1.bf16.msk.msra.mxu1 %vm3940_vm11, %v3492_v18 }
 0x420   :  { %v2322_v27 = vpop.permute.xlu0 %2321  ;;  %v2416_v15 = vpop.permute.xlu1 %2415  ;;  %3265 = vmatmul.mubr.msk.f32.vlgmr.msra.gmra.mrb[8].mxu1 %vm579_vm12, %v4797_v23 }
 0x421   :  { %v2331_v39 = vsel %vm205_vm1, %v4703_v26, %v2322_v27  ;;  %v2332_v62 = vsel %vm205_vm1, %v2322_v27, %v4780_v63  ;;  %2791 = vmatprep.mubr.f32.mxu1 %v5031_v31 }
 0x422   :  { %v3495_v21 = vpack.c.bf16 %v2332_v62, %v2286_v2  ;;  %v3497_v24 = vpack.c.bf16 %v2331_v39, %v2285_v49 }
 0x424   :  { %v2368_v22 = vpop.permute.xlu0 %2367  ;;  %v4811_v48 = vpop.permute.xlu1 %2473  ;;  %3266 = vmatmul.mubr.msk.f32.gmra.mrb[10].mxu1 %vm579_vm12, %v4809_v41  ;;  %3496 = vmatprep.subr.bf16.mxu0 %v3495_v21 }
 0x425   :  { %v2377_v26 = vsel %vm252_vm3, %v4726_v43, %v2368_v22  ;;  %v2378_v54 = vsel %vm252_vm3, %v2368_v22, %v4784_v55  ;;  %3498 = vmatpush1.bf16.msra.mxu0 %v3497_v24  ;;  %2939 = vmatprep.mubr.f32.mxu1 %v5031_v31 }
 0x428   :  { %v2414_v32 = vpop.permute.xlu0 %2413  ;;  %v4820_v3 = vpop.permute.xlu1 %2519 }
 0x429   :  { %v2423_v30 = vsel %vm299_vm4, %v4742_v60, %v2414_v32  ;;  %v2424_v5 = vsel %vm299_vm4, %v2414_v32, %v2416_v15 }
 0x42a   :  { %v3499_v44 = vpack.c.bf16 %v2424_v5, %v2378_v54  ;;  %v3501_v35 = vpack.c.bf16 %v2423_v30, %v2377_v26 }
 0x42c   :  { %v2472_v18 = vpop.permute.xlu0 %2471  ;;  %v4825_v16 = vpop.permute.xlu1 %2565  ;;  %3500 = vmatprep.subr.bf16.mxu0 %v3499_v44 }
 0x42d   :  { %v2481_v43 = vsel %vm358_vm5, %v2470_v17, %v2472_v18  ;;  %v2482_v49 = vsel %vm358_vm5, %v2472_v18, %v4811_v48  ;;  %3502 = vmatpush1.bf16.msra.mxu0 %v3501_v35 }
 0x42e   :  { %v3503_v2 = vpack.c.bf16 %v2482_v49, %v4544_v57  ;;  %v3505_v27 = vpack.c.bf16 %v2481_v43, %v4541_v46 }
 0x430   :  { %v2518_v39 = vpop.permute.xlu0 %2517  ;;  %v2282_v60 = vpop.permute.xlu1 %2281  ;;  %3504 = vmatprep.subr.bf16.mxu0 %v3503_v2 }
 0x431   :  { %v2527_v62 = vsel %vm405_vm6, %v4765_v50, %v2518_v39  ;;  %v2528_v21 = vsel %vm405_vm6, %v2518_v39, %v4820_v3  ;;  %3506 = vmatpush1.bf16.msra.mxu0 %v3505_v27 }
 0x434   :  { %v2564_v24 = vpop.permute.xlu0 %2563  ;;  %v2328_v17 = vpop.permute.xlu1 %2327 }
 0x435   :  { %v2573_v22 = vsel %vm452_vm7, %v4772_v11, %v2564_v24  ;;  %v2574_v57 = vsel %vm452_vm7, %v2564_v24, %v4825_v16  ;;  %v2694_v24 = vld [vmem:[#allocation3 + $0x1c8] sm:$0x1] }
 0x436   :  { %v3507_v26 = vpack.c.bf16 %v2574_v57, %v2528_v21  ;;  %v3509_v46 = vpack.c.bf16 %v2573_v22, %v2527_v62 }
 0x438   :  { %v2280_v54 = vpop.permute.xlu0 %2279  ;;  %v2374_v32 = vpop.permute.xlu1 %2373  ;;  %3508 = vmatprep.subr.bf16.mxu0 %v3507_v26 }
 0x439   :  { %v2287_v50 = vsel %vm158_vm2, %v4774_v40, %v2280_v54  ;;  %v2288_v30 = vsel %vm158_vm2, %v2280_v54, %v2282_v60  ;;  %3510 = vmatpush1.bf16.msra.mxu0 %v3509_v46 }
 0x43c   :  { %v2326_v5 = vpop.permute.xlu0 %2325  ;;  %v2420_v44 = vpop.permute.xlu1 %2419 }
 0x43d   :  { %v2333_v35 = vsel %vm205_vm1, %v4780_v63, %v2326_v5  ;;  %v2334_v11 = vsel %vm205_vm1, %v2326_v5, %v2328_v17  ;;  %v2693_v17 = vld [vmem:[#allocation3 + $0x1c0] sm:$0x1] }
 0x43e   :  { %v3517_v18 = vpack.c.bf16 %v2334_v11, %v2288_v30  ;;  %v3519_v43 = vpack.c.bf16 %v2333_v35, %v2287_v50 }
 0x440   :  { %v2372_v49 = vpop.permute.xlu0 %2371  ;;  %3518 = vmatprep.subr.bf16.mxu1 %v3517_v18  ;;  %v2570_v40 = vpop.permute.xlu1 %2569  ;;  %v2696_v18 = vld [vmem:[#allocation3 + $0x1d8] sm:$0x1] }
 0x441   :  { %v2379_v2 = vsel %vm252_vm3, %v4784_v55, %v2372_v49  ;;  %v2380_v27 = vsel %vm252_vm3, %v2372_v49, %v2374_v32  ;;  %3520 = vmatpush1.bf16.msra.mxu1 %v3519_v43  ;;  %v2695_v43 = vld [vmem:[#allocation3 + $0x1d0] sm:$0x1] }
 0x444   :  { %v2418_v39 = vpop.permute.xlu0 %2417  ;;  %v2612_v22 = vpop.permute.xlu1 %2611 }
 0x445   :  { %v2425_v60 = vsel %vm299_vm4, %v2416_v15, %v2418_v39  ;;  %v2426_v62 = vsel %vm299_vm4, %v2418_v39, %v2420_v44 }
 0x446   :  { %v3521_v21 = vpack.c.bf16 %v2426_v62, %v2380_v27  ;;  %v3523_v63 = vpack.c.bf16 %v2425_v60, %v2379_v2 }
 0x448   :  { %v2610_v57 = vpop.permute.xlu0 %2609  ;;  %3522 = vmatprep.subr.bf16.mxu1 %v3521_v21 }
 0x449   :  { %v2619_v26 = vsel %vm499_vm8, %v4778_v29, %v2610_v57  ;;  %v2620_v55 = vsel %vm499_vm8, %v2610_v57, %v2612_v22  ;;  %3524 = vmatpush1.bf16.msra.mxu1 %v3523_v63 }
 0x44a   :  { %v3511_v46 = vpack.c.bf16 %v2694_v24, %v2620_v55  ;;  %v3514_v54 = vpack.c.bf16 %v2693_v17, %v2619_v26 }
 0x44c   :  { %v2476_v32 = vpop.permute.xlu0 %2475  ;;  %3513 = vmatprep.subr.msk.bf16.mxu0 %vm3940_vm11, %v3511_v46 }
 0x44d   :  { %v2483_v15 = vsel %vm358_vm5, %v4811_v48, %v2476_v32  ;;  %v2484_v50 = vsel %vm358_vm5, %v2476_v32, %v4616_v61  ;;  %3516 = vmatpush1.bf16.msk.msra.mxu0 %vm3940_vm11, %v3514_v54 }
 0x44e   :  { %v3525_v29 = vpack.c.bf16 %v2484_v50, %v4566_v0  ;;  %v3527_v30 = vpack.c.bf16 %v2483_v15, %v4563_v59 }
 0x450   :  { %v2522_v5 = vpop.permute.xlu0 %2521  ;;  %3269 = vmatmul.mubr.msk.f32.vlgmr.msra.gmra.mrb[10].mxu0 %vm579_vm12, %v4797_v23  ;;  %3526 = vmatprep.subr.bf16.mxu1 %v3525_v29 }
 0x451   :  { %v2529_v44 = vsel %vm405_vm6, %v4820_v3, %v2522_v5  ;;  %v2530_v48 = vsel %vm405_vm6, %v2522_v5, %v4627_v8  ;;  %3528 = vmatpush1.bf16.msra.mxu1 %v3527_v30  ;;  %2868 = vmatprep.mubr.f32.mxu0 %v5031_v31  ;;  %v2616_v3 = vpop.permute.xlu1 %2615 }
 0x454   :  { %v2568_v61 = vpop.permute.xlu0 %2567  ;;  %3270 = vmatmul.mubr.msk.f32.gmra.mrb[12].mxu0 %vm579_vm12, %v4809_v41 }
 0x455   :  { %v2575_v59 = vsel %vm452_vm7, %v4825_v16, %v2568_v61  ;;  %v2576_v0 = vsel %vm452_vm7, %v2568_v61, %v2570_v40 }
 0x456   :  { %v3529_v35 = vpack.c.bf16 %v2576_v0, %v2530_v48  ;;  %v3531_v11 = vpack.c.bf16 %v2575_v59, %v2529_v44 }
 0x458   :  { %v2614_v49 = vpop.permute.xlu0 %2613  ;;  %3530 = vmatprep.subr.bf16.mxu1 %v3529_v35 }
 0x459   :  { %v2621_v8 = vsel %vm499_vm8, %v2612_v22, %v2614_v49  ;;  %v2622_v2 = vsel %vm499_vm8, %v2614_v49, %v2616_v3  ;;  %3532 = vmatpush1.bf16.msra.mxu1 %v3531_v11 }
 0x45a   :  { %v3533_v27 = vpack.c.bf16 %v2696_v18, %v2622_v2  ;;  %v3536_v39 = vpack.c.bf16 %v2695_v43, %v2621_v8 }
 0x45c   :  { %3535 = vmatprep.subr.msk.bf16.mxu1 %vm3940_vm11, %v3533_v27  ;;  %v5032_v27 = vld [vmem:[#allocation8_spill] sm:$0xff] }
 0x45d   :  { %3538 = vmatpush1.bf16.msk.msra.mxu1 %vm3940_vm11, %v3536_v39 }
 0x460   :  { %3273 = vmatmul.mubr.msk.f32.vlgmr.msra.gmra.mrb[12].mxu1 %vm579_vm12, %v4797_v23 }
 0x461   :  { %2945 = vmatprep.mubr.f32.mxu1 %v5031_v31 }
 0x464   :  { %3274 = vmatmul.mubr.msk.f32.gmra.mrb[14].mxu1 %vm579_vm12, %v4809_v41 }
 0x487   :  { %v3143_v16 = vpop.xlane.xlu1 %3142 }
 0x488   :  { %v3144_v40 = vmul.f32 0.00390625, %v3143_v16  ;;  %v5033_v16 = vld [vmem:[#allocation9_spill] sm:$0xff] }
 0x48a   :  { %v3145_v60 = vsub.f32 %v4220_v51, %v3144_v40  ;;  %v3146_v62 = vsub.f32 %v4234_v45, %v3144_v40  ;;  %v3147_v21 = vsub.f32 %v4268_v20, %v3144_v40  ;;  %v3148_v63 = vsub.f32 %v4308_v47, %v3144_v40 }
 0x48b   :  { %v3149_v38 = vsub.f32 %v4291_v28, %v3144_v40  ;;  %v3150_v41 = vsub.f32 %v4325_v6, %v3144_v40  ;;  %v3178_v30 = vmul.f32 %v3144_v40, %v4631_v1  ;;  %v3179_v48 = vmul.f32 %v3144_v40, %v4633_v4 }
 0x48c   :  { %v3151_v24 = vmul.f32 %v3145_v60, %v4631_v1  ;;  %v3152_v23 = vmul.f32 %v3146_v62, %v4633_v4  ;;  %v3153_v31 = vmul.f32 %v3147_v21, %v4638_v12  ;;  %v3154_v17 = vmul.f32 %v3148_v63, %v4653_v25 }
 0x48d   :  { %v3155_v26 = vmul.f32 %v3149_v38, %v4663_v52  ;;  %v3156_v32 = vmul.f32 %v3150_v41, %v4678_v10  ;;  %v3180_v61 = vmul.f32 %v3144_v40, %v4638_v12 }
 0x48e   :  { %v3157_v22 = vmul.f32 %v3151_v24, %v3151_v24  ;;  %v3158_v57 = vmul.f32 %v3152_v23, %v3152_v23  ;;  %v3159_v55 = vmul.f32 %v3153_v31, %v3153_v31  ;;  %v3160_v15 = vmul.f32 %v3154_v17, %v3154_v17  ;;  %v5034_v31 = vld [vmem:[#allocation10_spill] sm:$0xff] }
 0x48f   :  { %v3161_v5 = vmul.f32 %v3155_v26, %v3155_v26  ;;  %v3162_v43 = vmul.f32 %v3156_v32, %v3156_v32 }
 0x490   :  { %v3163_v46 = vadd.f32 %v3158_v57, %v3157_v22 }
 0x492   :  { %v3018_v54 = vpop.xlane.xlu0 %3017  ;;  %v3164_v50 = vadd.f32 %v3163_v46, %v3159_v55  ;;  %v5036_v46 = vld [vmem:[#allocation7_spill] sm:$0xff] }
 0x493   :  { %v3019_v29 = vmul.f32 0.00390625, %v3018_v54 }
 0x494   :  { %v3165_v44 = vadd.f32 %v3164_v50, %v3160_v15  ;;  %v3183_v15 = vmul.f32 %v3144_v40, %v4678_v10 }
 0x495   :  { %v3020_v59 = vsub.f32 %v4220_v51, %v3019_v29  ;;  %v3021_v0 = vsub.f32 %v4234_v45, %v3019_v29  ;;  %v3022_v35 = vsub.f32 %v4268_v20, %v3019_v29  ;;  %v3023_v11 = vsub.f32 %v4308_v47, %v3019_v29 }
 0x496   :  { %v827_v18 = vpop.xlane.xlu0 %826  ;;  %v3166_v3 = vadd.f32 %v3165_v44, %v3161_v5  ;;  %v3024_v49 = vsub.f32 %v4291_v28, %v3019_v29  ;;  %v3025_v8 = vsub.f32 %v4325_v6, %v3019_v29  ;;  %v3053_v45 = vmul.f32 %v3019_v29, %v5032_v27 }
 0x497   :  { %v828_v2 = vmul.f32 0.001953125, %v827_v18  ;;  %v3026_v39 = vmul.f32 %v3020_v59, %v5032_v27  ;;  %v3027_v60 = vmul.f32 %v3021_v0, %v5033_v16  ;;  %v3028_v51 = vmul.f32 %v3022_v35, %v4687_v58 }
 0x498   :  { %v3167_v62 = vadd.f32 %v3166_v3, %v3162_v43  ;;  %v3181_v20 = vmul.f32 %v3144_v40, %v4653_v25  ;;  %v3182_v47 = vmul.f32 %v3144_v40, %v4663_v52  ;;  %v3029_v21 = vmul.f32 %v3023_v11, %v4712_v14 }
 0x499   :  { %v3032_v63 = vmul.f32 %v3026_v39, %v3026_v39  ;;  %v3033_v28 = vmul.f32 %v3027_v60, %v3027_v60  ;;  %v4916_v6 = vsub.f32 %v4691_v42, %v828_v2  ;;  %v3030_v38 = vmul.f32 %v3024_v49, %v4724_v53  ;;  %v5035_v42 = vld [vmem:[#allocation6_spill] sm:$0xff] }
 0x49a   :  { %3168 = vadd.xlane.f32.xlu1 %v3167_v62  ;;  %v3031_v24 = vmul.f32 %v3025_v8, %v4738_v37  ;;  %v3034_v23 = vmul.f32 %v3028_v51, %v3028_v51  ;;  %v4921_v41 = vsub.f32 %v5034_v31, %v828_v2  ;;  %v4924_v22 = vsub.f32 %v4720_v19, %v828_v2 }
 0x49b   :  { %v3038_v17 = vadd.f32 %v3033_v28, %v3032_v63  ;;  %v4927_v57 = vsub.f32 %v4735_v56, %v828_v2  ;;  %v4930_v26 = vsub.f32 %v4749_v36, %v828_v2  ;;  %v835_v55 = vmul.f32 %v4916_v6, %v5035_v42 }
 0x49c   :  { %v836_v54 = vmul.f32 %v4921_v41, %v5036_v46  ;;  %v3184_v32 = vadd.f32 %v3178_v30, %v3053_v45  ;;  %v3035_v50 = vmul.f32 %v3029_v21, %v3029_v21  ;;  %v4938_v19 = vsub.f32 %v4759_v33, %v828_v2 }
 0x49d   :  { %v3039_v5 = vadd.f32 %v3038_v17, %v3034_v23  ;;  %v837_v56 = vmul.f32 %v4924_v22, %v4263_v13  ;;  %v838_v36 = vmul.f32 %v4927_v57, %v4301_v9  ;;  %v841_v44 = vmul.f32 %v835_v55, %v835_v55 }
 0x49e   :  { %v842_v59 = vmul.f32 %v836_v54, %v836_v54  ;;  %v3054_v0 = vmul.f32 %v3019_v29, %v5033_v16  ;;  %v3036_v35 = vmul.f32 %v3030_v38, %v3030_v38  ;;  %v3037_v11 = vmul.f32 %v3031_v24, %v3031_v24 }
 0x49f   :  { %v3040_v30 = vadd.f32 %v3039_v5, %v3035_v50  ;;  %v839_v40 = vmul.f32 %v4930_v26, %v4283_v34  ;;  %v843_v18 = vmul.f32 %v837_v56, %v837_v56  ;;  %v3055_v3 = vmul.f32 %v3019_v29, %v4687_v58 }
 0x4a0   :  { %v847_v43 = vadd.f32 %v842_v59, %v841_v44  ;;  %v3185_v33 = vadd.f32 %v3179_v48, %v3054_v0  ;;  %v3056_v13 = vmul.f32 %v3019_v29, %v4712_v14  ;;  %v3057_v9 = vmul.f32 %v3019_v29, %v4724_v53 }
 0x4a1   :  { %v3041_v49 = vadd.f32 %v3040_v30, %v3036_v35  ;;  %v3058_v8 = vmul.f32 %v3019_v29, %v4738_v37  ;;  %v840_v2 = vmul.f32 %v4938_v19, %v4318_v7  ;;  %v844_v39 = vmul.f32 %v838_v36, %v838_v36 }
 0x4a2   :  { %v848_v60 = vadd.f32 %v847_v43, %v843_v18  ;;  %v3186_v51 = vadd.f32 %v3180_v61, %v3055_v3  ;;  %v3187_v34 = vadd.f32 %v3181_v20, %v3056_v13  ;;  %v3188_v45 = vadd.f32 %v3182_v47, %v3057_v9 }
 0x4a3   :  { %v3042_v62 = vadd.f32 %v3041_v49, %v3037_v11  ;;  %v3189_v21 = vadd.f32 %v3183_v15, %v3058_v8  ;;  %v845_v48 = vmul.f32 %v839_v40, %v839_v40  ;;  %v846_v28 = vmul.f32 %v840_v2, %v840_v2 }
 0x4a4   :  { %v849_v63 = vadd.f32 %v848_v60, %v844_v39 }
 0x4a5   :  { %3043 = vadd.xlane.f32.xlu0 %v3042_v62 }
 0x4a6   :  { %v850_v38 = vadd.f32 %v849_v63, %v845_v48 }
 0x4a8   :  { %v851_v24 = vadd.f32 %v850_v38, %v846_v28 }
 0x4aa   :  { %852 = vadd.xlane.f32.xlu0 %v851_v24 }
 0x4f3   :  { %v4953_v23 = vpop.f32.mrb[8].mxu1 }
 0x4f4   :  { %v4955_v29 = vpop.f32.mrb[9].mxu1 }
 0x4f7   :  { %v2793_v31 = vpop.f32.mrb[10].mxu1 }
 0x4f8   :  { %v4957_v7 = vadd.f32 %v3184_v32, %v2793_v31  ;;  %v2795_v17 = vpop.f32.mrb[11].mxu1 }
 0x4f9   :  { %v4959_v61 = vadd.f32 %v3185_v33, %v2795_v17 }
 0x523   :  { %v2864_v20 = vpop.f32.mrb[10].mxu0 }
 0x524   :  { %v2866_v47 = vpop.f32.mrb[11].mxu0 }
 0x527   :  { %v3169_v42 = vpop.xlane.xlu1 %3168  ;;  %v2870_v55 = vpop.f32.mrb[12].mxu0 }
 0x528   :  { %v3170_v46 = vmul.f32 0.003921569, %v3169_v42  ;;  %v4961_v54 = vadd.f32 %v3186_v51, %v2870_v55  ;;  %v2872_v15 = vpop.f32.mrb[13].mxu0 }
 0x529   :  { %v4963_v50 = vadd.f32 %v3187_v34, %v2872_v15 }
 0x52a   :  { %3572 = vrsqrt.f32 %v3170_v46  ;;  %vm3173_vm14 = vcmp.eq.f32.partialorder %v3170_v46, inf  ;;  %v3176_v3 = vand.u32 2147483648, %v3170_v46  ;;  %vm3175_vm15 = vcmp.eq.f32.partialorder %v3170_v46, 0.0 }
 0x532   :  { %v3044_v5 = vpop.xlane.xlu0 %3043 }
 0x533   :  { %v3045_v56 = vmul.f32 0.003921569, %v3044_v5  ;;  %v2941_v36 = vpop.f32.mrb[12].mxu1 }
 0x534   :  { %v2943_v44 = vpop.f32.mrb[13].mxu1  ;;  %v3573_v32 = vpop.eup %3572 }
 0x535   :  { %3574 = vrsqrt.f32 %v3045_v56  ;;  %v3172_v35 = vmul.f32 %v3573_v32, %v3170_v46  ;;  %vm3048_vm0 = vcmp.eq.f32.partialorder %v3045_v56, inf  ;;  %v3051_v8 = vand.u32 2147483648, %v3045_v56 }
 0x536   :  { %vm3050_vm1 = vcmp.eq.f32.partialorder %v3045_v56, 0.0 }
 0x537   :  { %v853_v59 = vpop.xlane.xlu0 %852  ;;  %v2947_v0 = vpop.f32.mrb[14].mxu1  ;;  %v3174_v33 = vsel %vm3173_vm14, %v3170_v46, %v3172_v35 }
 0x538   :  { %v854_v11 = vmul.f32 0.001953125, %v853_v59  ;;  %v3218_v30 = vadd.f32 %v3188_v45, %v2947_v0  ;;  %v2949_v40 = vpop.f32.mrb[15].mxu1  ;;  %v3177_v13 = vsel %vm3175_vm15, %v3176_v3, %v3174_v33 }
 0x539   :  { %v3219_v43 = vadd.f32 %v3189_v21, %v2949_v40  ;;  %v3190_v39 = vmul.f32 %v3177_v13, %v4631_v1  ;;  %v3191_v51 = vmul.f32 %v3177_v13, %v4633_v4  ;;  %v3192_v62 = vmul.f32 %v3177_v13, %v4638_v12 }
 0x53a   :  { %v855_v18 = vadd.f32 1e-05, %v854_v11  ;;  %v3193_v34 = vmul.f32 %v3177_v13, %v4653_v25  ;;  %v3194_v38 = vmul.f32 %v3177_v13, %v4663_v52  ;;  %v3195_v4 = vmul.f32 %v3177_v13, %v4678_v10 }
 0x53c   :  { %3576 = vrsqrt.f32 %v855_v18 }
 0x53f   :  { %v3575_v49 = vpop.eup %3574 }
 0x540   :  { %v3047_v9 = vmul.f32 %v3575_v49, %v3045_v56 }
 0x542   :  { %v3049_v2 = vsel %vm3048_vm0, %v3045_v56, %v3047_v9 }
 0x543   :  { %v3052_v60 = vsel %vm3050_vm1, %v3051_v8, %v3049_v2 }
 0x544   :  { %v3065_v45 = vmul.f32 %v3052_v60, %v5032_v27  ;;  %v3066_v21 = vmul.f32 %v3052_v60, %v5033_v16  ;;  %v3067_v48 = vmul.f32 %v3052_v60, %v4687_v58  ;;  %v3068_v63 = vmul.f32 %v3052_v60, %v4712_v14 }
 0x545   :  { %v3069_v28 = vmul.f32 %v3052_v60, %v4724_v53  ;;  %v3070_v1 = vmul.f32 %v3052_v60, %v4738_v37 }
 0x546   :  { %v3577_v24 = vpop.eup %3576  ;;  %v3196_v12 = vadd.f32 %v3190_v39, %v3065_v45  ;;  %v3197_v31 = vadd.f32 %v3191_v51, %v3066_v21  ;;  %v3198_v25 = vadd.f32 %v3192_v62, %v3067_v48  ;;  %v3199_v17 = vadd.f32 %v3193_v34, %v3068_v63 }
 0x547   :  { %v861_v27 = vmul.f32 %v3577_v24, %v4930_v26  ;;  %v3200_v16 = vadd.f32 %v3194_v38, %v3069_v28  ;;  %v862_v58 = vmul.f32 %v3577_v24, %v4938_v19  ;;  %v3201_v42 = vadd.f32 %v3195_v4, %v3070_v1 }
 0x548   :  { %v3202_v14 = vadd.f32 %v3196_v12, %v4953_v23  ;;  %v3203_v53 = vadd.f32 %v3197_v31, %v4955_v29  ;;  %v3204_v52 = vadd.f32 %v3198_v25, %v2864_v20  ;;  %v3205_v55 = vadd.f32 %v3199_v17, %v2866_v47 }
 0x549   :  { %v867_v37 = vmax.f32 %v861_v27, 0.0  ;;  %v3206_v46 = vadd.f32 %v3200_v16, %v2941_v36  ;;  %v868_v10 = vmax.f32 %v862_v58, 0.0  ;;  %v3207_v15 = vadd.f32 %v3201_v42, %v2943_v44 }
 0x54a   :  { %v857_v5 = vmul.f32 %v3577_v24, %v4916_v6  ;;  %v858_v56 = vmul.f32 %v3577_v24, %v4921_v41  ;;  %v859_v26 = vmul.f32 %v3577_v24, %v4924_v22  ;;  %v860_v32 = vmul.f32 %v3577_v24, %v4927_v57 }
 0x54b   :  { %v3212_v19 = vmul.f32 %v3206_v46, %v867_v37  ;;  %v3213_v59 = vmul.f32 %v3207_v15, %v868_v10 }
 0x54c   :  { %v863_v0 = vmax.f32 %v857_v5, 0.0  ;;  %v864_v23 = vmax.f32 %v858_v56, 0.0  ;;  %v865_v35 = vmax.f32 %v859_v26, 0.0  ;;  %v866_v29 = vmax.f32 %v860_v32, 0.0 }
 0x54d   :  { %v3224_v20 = vadd.f32 %v3218_v30, %v3212_v19  ;;  %v3225_v47 = vadd.f32 %v3219_v43, %v3213_v59 }
 0x54e   :  { %v3208_v11 = vmul.f32 %v3202_v14, %v863_v0  ;;  %v3209_v36 = vmul.f32 %v3203_v53, %v864_v23  ;;  %v3210_v40 = vmul.f32 %v3204_v52, %v865_v35  ;;  %v3211_v44 = vmul.f32 %v3205_v55, %v866_v29 }
 0x54f   :  { %3230 = vst [vmem:[%s5014_s7 + $0x20] sm:$0xff] %v3224_v20  ;;  %3231 = vst [vmem:[%s5014_s7 + $0x28] sm:$0xff] %v3225_v47 }
 0x550   :  { %v3220_v6 = vadd.f32 %v4957_v7, %v3208_v11  ;;  %v3221_v41 = vadd.f32 %v4959_v61, %v3209_v36  ;;  %v3222_v22 = vadd.f32 %v4961_v54, %v3210_v40  ;;  %v3223_v57 = vadd.f32 %v4963_v50, %v3211_v44 }
 0x552   :  { %3226 = vst [vmem:[%s5014_s7] sm:$0xff] %v3220_v6  ;;  %3227 = vst [vmem:[%s5014_s7 + $0x8] sm:$0xff] %v3221_v41 }
 0x553   :  { %3228 = vst [vmem:[%s5014_s7 + $0x10] sm:$0xff] %v3222_v22  ;;  %3229 = vst [vmem:[%s5014_s7 + $0x18] sm:$0xff] %v3223_v57 }

</bundles_post_ra>
